<compile_context>
chip_gen: v7x
topology: tpu7x:2x2x1
jax: 0.10.0
libtpu: 0.0.40
codegen_flags: <defaults>
</compile_context>

<pallas_src>
import functools

import jax
import jax.numpy as jnp
from jax import lax
from jax.experimental import pallas as pl
from jax.experimental.pallas import tpu as pltpu


def _round_up(x, m):
    return ((x + m - 1) // m) * m


# ---------------------------------------------------------------------------
# Pass 1: fused Q/K/V projection (1x1 conv == per-token matmul).
# ---------------------------------------------------------------------------
def qkv_proj_kernel(x_ref, w_ref, b_ref, q_ref, k_ref, v_ref, *, p_rows):
    """x_ref: (1, C, tn) f32; w_ref: (2P+C, C) bf16; b_ref: (2P+C, 1) f32.
    Writes q/k: (1, P, tn) bf16 and v: (1, C, tn) bf16."""
    x = x_ref[0].astype(jnp.bfloat16)                                   # (C, tn)
    qkv = jnp.dot(w_ref[...], x,
                  preferred_element_type=jnp.float32) + b_ref[...]      # (2P+C, tn)
    qkv = qkv.astype(jnp.bfloat16)
    q_ref[0] = qkv[:p_rows]
    k_ref[0] = qkv[p_rows:2 * p_rows]
    v_ref[0] = qkv[2 * p_rows:]


# ---------------------------------------------------------------------------
# Pass 2: flash attention + gamma * out + residual.
# ---------------------------------------------------------------------------
def pam_attn_kernel(q_ref, k_ref, v_ref, xres_ref, gamma_ref, out_ref,
                    m_scr, l_scr, acc_scr, *, tk, n_valid, needs_mask):
    """Layouts (channels / padded query dim on sublanes, tokens on lanes):
      q_ref: (1, P, tq) bf16   k_ref: (1, P, tk) bf16   v_ref: (1, C, tk) bf16
      xres_ref / out_ref: (1, C, tq)   gamma_ref: (1,) f32 in SMEM
      scratch: m/l (1, tq) f32, acc (C, tq) f32
    """
    ki = pl.program_id(2)

    @pl.when(ki == 0)
    def _init():
        m_scr[...] = jnp.full_like(m_scr, -jnp.inf)
        l_scr[...] = jnp.zeros_like(l_scr)
        acc_scr[...] = jnp.zeros_like(acc_scr)

    # Energy tile stored transposed: e[kk, qq] = <k_kk, q_qq>  -> (tk, tq).
    # TODO(synk): confirm from the bundle dump that this contracting-dim-0
    # matmul does not emit a per-step XLU transpose; if it does, store Q
    # transposed (N, P) in pass 1 instead.
    e = lax.dot_general(k_ref[0], q_ref[0],
                        dimension_numbers=(((0,), (0,)), ((), ())),
                        preferred_element_type=jnp.float32)
    if needs_mask:
        kk = lax.broadcasted_iota(jnp.int32, e.shape, 0) + ki * tk
        e = jnp.where(kk < n_valid, e, -jnp.inf)

    # Online softmax over the kv axis (axis 0 == sublanes), all in f32.
    m_prev = m_scr[...]                                                 # (1, tq)
    m_new = jnp.maximum(m_prev, jnp.max(e, axis=0, keepdims=True))      # (1, tq)
    alpha = jnp.exp(m_prev - m_new)                                     # (1, tq)
    p = jnp.exp(e - m_new)                                              # (tk, tq)
    l_scr[...] = alpha * l_scr[...] + jnp.sum(p, axis=0, keepdims=True)
    acc_scr[...] = alpha * acc_scr[...] + jnp.dot(
        v_ref[0], p.astype(jnp.bfloat16),
        preferred_element_type=jnp.float32)                             # (C, tq)
    m_scr[...] = m_new

    @pl.when(ki == pl.num_programs(2) - 1)
    def _finalize():
        inv_l = pl.reciprocal(l_scr[...], approx=True)                  # (1, tq)
        out_cq = gamma_ref[0] * (acc_scr[...] * inv_l) \
            + xres_ref[0].astype(jnp.float32)                           # (C, tq)
        out_ref[0] = out_cq.astype(out_ref.dtype)


@functools.partial(jax.jit, static_argnames=("tq", "tk"))
def pam_module_forward(x_nchw, wq, bq, wk, bk, wv, bv, gamma, *, tq=256, tk=512):
    """PAM_Module forward.  x_nchw: (B, C, H, W); wq/wk: (C//8, C); wv: (C, C);
    bq/bk: (C//8,); bv: (C,); gamma: (1,).  Returns (B, C, H, W)."""
    B, C, H, W = x_nchw.shape
    N = H * W
    C8 = wq.shape[0]
    P = _round_up(C8, 128)                 # pad C//8 up to a multiple of 128

    assert tq % 128 == 0 and tk % tq == 0, "need 128 | tq and tq | tk"

    # Tile / padding choice: pad N to a tile multiple; shrink tiles for small N.
    n128 = _round_up(N, 128)
    if n128 >= tk:
        Np = _round_up(N, tk)
    else:
        tq = tk = n128
        Np = n128
    tn = tk                                # projection token tile
    needs_mask = (Np != N)

    # Free reshape; zero-pad the token axis only when needed.
    x_bcn = x_nchw.reshape(B, C, N)
    if needs_mask:
        x_bcn = jnp.pad(x_bcn, ((0, 0), (0, 0), (0, Np - N)))

    # Stacked [Wq; Wk; Wv] weights (bf16 for the MXU) and biases (f32).
    R = 2 * P + C
    w_stack = jnp.zeros((R, C), jnp.bfloat16)
    w_stack = w_stack.at[:C8].set(wq.astype(jnp.bfloat16))
    w_stack = w_stack.at[P:P + C8].set(wk.astype(jnp.bfloat16))
    w_stack = w_stack.at[2 * P:].set(wv.astype(jnp.bfloat16))
    b_stack = jnp.zeros((R, 1), jnp.float32)
    b_stack = b_stack.at[:C8, 0].set(bq.astype(jnp.float32))
    b_stack = b_stack.at[P:P + C8, 0].set(bk.astype(jnp.float32))
    b_stack = b_stack.at[2 * P:, 0].set(bv.astype(jnp.float32))
    gamma_s = gamma.astype(jnp.float32).reshape(1)

    vmem_lim = 48 * 1024 * 1024            # safe on v7x (64 MiB), ample on v5e/v6e

    # ---- pass 1: fused Q/K/V projection ------------------------------------
    q_p, k_p, v_p = pl.pallas_call(
        functools.partial(qkv_proj_kernel, p_rows=P),
        out_shape=(
            jax.ShapeDtypeStruct((B, P, Np), jnp.bfloat16),
            jax.ShapeDtypeStruct((B, P, Np), jnp.bfloat16),
            jax.ShapeDtypeStruct((B, C, Np), jnp.bfloat16),
        ),
        grid_spec=pltpu.PrefetchScalarGridSpec(
            num_scalar_prefetch=0,
            grid=(B, Np // tn),
            in_specs=[
                pl.BlockSpec((1, C, tn), lambda b, j: (b, 0, j)),        # x tile
                pl.BlockSpec((R, C), lambda b, j: (0, 0)),               # [Wq;Wk;Wv]
                pl.BlockSpec((R, 1), lambda b, j: (0, 0)),               # [bq;bk;bv]
            ],
            out_specs=[
                pl.BlockSpec((1, P, tn), lambda b, j: (b, 0, j)),        # Q
                pl.BlockSpec((1, P, tn), lambda b, j: (b, 0, j)),        # K
                pl.BlockSpec((1, C, tn), lambda b, j: (b, 0, j)),        # V
            ],
        ),
        compiler_params=pltpu.CompilerParams(
            dimension_semantics=("parallel", "parallel"),
            vmem_limit_bytes=vmem_lim,
        ),
    )(x_bcn, w_stack, b_stack)

    # ---- pass 2: flash attention + residual ---------------------------------
    out_bcn = pl.pallas_call(
        functools.partial(pam_attn_kernel, tk=tk, n_valid=N, needs_mask=needs_mask),
        out_shape=jax.ShapeDtypeStruct((B, C, Np), x_bcn.dtype),
        grid_spec=pltpu.PrefetchScalarGridSpec(
            num_scalar_prefetch=0,
            grid=(B, Np // tq, Np // tk),
            in_specs=[
                pl.BlockSpec((1, P, tq), lambda b, qi, ki: (b, 0, qi)),  # Q tile
                pl.BlockSpec((1, P, tk), lambda b, qi, ki: (b, 0, ki)),  # K tile
                pl.BlockSpec((1, C, tk), lambda b, qi, ki: (b, 0, ki)),  # V tile
                pl.BlockSpec((1, C, tq), lambda b, qi, ki: (b, 0, qi)),  # residual x
                pl.BlockSpec(memory_space=pltpu.MemorySpace.SMEM),       # gamma
            ],
            out_specs=pl.BlockSpec((1, C, tq), lambda b, qi, ki: (b, 0, qi)),
            scratch_shapes=[
                pltpu.VMEM((1, tq), jnp.float32),      # running max m
                pltpu.VMEM((1, tq), jnp.float32),      # running sum l
                pltpu.VMEM((C, tq), jnp.float32),      # output accumulator
            ],
        ),
        compiler_params=pltpu.CompilerParams(
            dimension_semantics=("parallel", "parallel", "arbitrary"),
            vmem_limit_bytes=vmem_lim,
        ),
    )(q_p, k_p, v_p, x_bcn, gamma_s)

    if needs_mask:
        out_bcn = out_bcn[:, :, :N]
    return out_bcn.reshape(B, C, H, W)


def pam_reference(x, wq, bq, wk, bk, wv, bv, gamma):
    """Pure-jnp f32 reference of PAM_Module.forward (for a sanity check)."""
    B, C, H, W = x.shape
    N = H * W
    xf = x.reshape(B, C, N).astype(jnp.float32)
    q = jnp.einsum("oc,bcn->bon", wq, xf) + bq[None, :, None]            # (B, C8, N)
    k = jnp.einsum("oc,bcn->bon", wk, xf) + bk[None, :, None]            # (B, C8, N)
    v = jnp.einsum("oc,bcn->bon", wv, xf) + bv[None, :, None]            # (B, C,  N)
    energy = jnp.einsum("bci,bcj->bij", q, k)                            # (B, N, N)
    attn = jax.nn.softmax(energy, axis=-1)
    out = jnp.einsum("bcj,bij->bci", v, attn)                            # (B, C, N)
    out = gamma.reshape(()) * out + xf
    return out.reshape(B, C, H, W)


def _run_case(key, B, C, H, W):
    C8 = C // 8
    kx, k1, k2, k3, k4, k5, k6 = jax.random.split(key, 7)
    x = jax.random.normal(kx, (B, C, H, W), dtype=jnp.float32)
    wq = 0.1 * jax.random.normal(k1, (C8, C), dtype=jnp.float32)
    bq = 0.1 * jax.random.normal(k2, (C8,), dtype=jnp.float32)
    wk = 0.1 * jax.random.normal(k3, (C8, C), dtype=jnp.float32)
    bk = 0.1 * jax.random.normal(k4, (C8,), dtype=jnp.float32)
    wv = 0.1 * jax.random.normal(k5, (C, C), dtype=jnp.float32)
    bv = 0.1 * jax.random.normal(k6, (C,), dtype=jnp.float32)
    # The module initializes gamma to 0; use a nonzero value so the attention
    # path is actually exercised by the numeric check.
    gamma = jnp.full((1,), 0.5, dtype=jnp.float32)

    out = pam_module_forward(x, wq, bq, wk, bk, wv, bv, gamma)
    jax.block_until_ready(out)
    assert out.shape == (B, C, H, W)

    ref = pam_reference(x, wq, bq, wk, bk, wv, bv, gamma)
    max_err = float(jnp.max(jnp.abs(out - ref)))
    assert max_err < 3e-2, f"max abs err {max_err} for shape {(B, C, H, W)}"


if __name__ == "__main__":
    key = jax.random.PRNGKey(0)
    k_a, k_b = jax.random.split(key)
    # Aligned case: N = 256 divides the (shrunk) tiles exactly.
    _run_case(k_a, B=2, C=32, H=16, W=16)
    # Non-aligned case: N = 144 exercises the pad-and-mask path.
    _run_case(k_b, B=2, C=32, H=12, W=12)
    print("KERNEL_OK")
</pallas_src>

<mosaic_0001>
module attributes {stable_mosaic.version = 11 : i64} {
  func.func @qkv_proj_kernel(%arg0: i32, %arg1: i32, %arg2: memref<1x32x256xf32, #tpu.memory_space<vmem>>, %arg3: memref<288x32xbf16, #tpu.memory_space<vmem>>, %arg4: memref<288x1xf32, #tpu.memory_space<vmem>>, %arg5: memref<1x128x256xbf16, #tpu.memory_space<vmem>>, %arg6: memref<1x128x256xbf16, #tpu.memory_space<vmem>>, %arg7: memref<1x32x256xbf16, #tpu.memory_space<vmem>>) attributes {dimension_semantics = [#tpu.dimension_semantics<parallel>, #tpu.dimension_semantics<parallel>], iteration_bounds = array<i64: 2, 1>, scalar_prefetch = 0 : i64, scratch_operands = 0 : i64, tpu.core_type = #tpu.core_type<tc>, window_params = [{transform_indices = @transform_0, window_bounds = array<i64: 1, 32, 256>}, {pipeline_mode = #tpu.pipeline_mode<synchronous>, transform_indices = @transform_1, window_bounds = array<i64: 288, 32>}, {pipeline_mode = #tpu.pipeline_mode<synchronous>, transform_indices = @transform_2, window_bounds = array<i64: 288, 1>}, {transform_indices = @transform_3, window_bounds = array<i64: 1, 128, 256>}, {transform_indices = @transform_4, window_bounds = array<i64: 1, 128, 256>}, {transform_indices = @transform_5, window_bounds = array<i64: 1, 32, 256>}]} {
    %c0 = arith.constant 0 : index
    %c0_0 = arith.constant 0 : index
    %c0_1 = arith.constant 0 : index
    %0 = vector.load %arg2[%c0, %c0_0, %c0_1] : memref<1x32x256xf32, #tpu.memory_space<vmem>>, vector<1x32x256xf32>
    %1 = vector.shape_cast %0 : vector<1x32x256xf32> to vector<32x256xf32>
    %2 = arith.truncf %1 : vector<32x256xf32> to vector<32x256xbf16>
    %c0_2 = arith.constant 0 : index
    %c0_3 = arith.constant 0 : index
    %3 = vector.load %arg3[%c0_2, %c0_3] : memref<288x32xbf16, #tpu.memory_space<vmem>>, vector<288x32xbf16>
    %cst = arith.constant dense<0.000000e+00> : vector<288x256xf32>
    %4 = tpu.matmul %3, %2, %cst {dimension_numbers = #tpu.dot_dimension_numbers<[1], [0], [0], [1], [0, 0, 1, 1], [], []>} : vector<288x32xbf16>, vector<32x256xbf16>, vector<288x256xf32> -> vector<288x256xf32>
    %c0_4 = arith.constant 0 : index
    %c0_5 = arith.constant 0 : index
    %5 = vector.load %arg4[%c0_4, %c0_5] : memref<288x1xf32, #tpu.memory_space<vmem>>, vector<288x1xf32>
    %6 = vector.broadcast %5 : vector<288x1xf32> to vector<288x256xf32>
    %7 = arith.addf %4, %6 : vector<288x256xf32>
    %8 = arith.truncf %7 : vector<288x256xf32> to vector<288x256xbf16>
    %9 = vector.extract_strided_slice %8 {offsets = [0, 0], sizes = [128, 256], strides = [1, 1]} : vector<288x256xbf16> to vector<128x256xbf16>
    %c0_6 = arith.constant 0 : index
    %c0_7 = arith.constant 0 : index
    %c0_8 = arith.constant 0 : index
    %10 = vector.load %arg5[%c0_6, %c0_7, %c0_8] : memref<1x128x256xbf16, #tpu.memory_space<vmem>>, vector<1x128x256xbf16>
    %11 = vector.shape_cast %10 : vector<1x128x256xbf16> to vector<128x256xbf16>
    %12 = vector.shape_cast %9 : vector<128x256xbf16> to vector<1x128x256xbf16>
    tpu.vector_store %arg5[%c0_6, %c0_7, %c0_8], %12 {strides = array<i32>} : memref<1x128x256xbf16, #tpu.memory_space<vmem>>, vector<1x128x256xbf16>,
    %13 = vector.extract_strided_slice %8 {offsets = [128, 0], sizes = [128, 256], strides = [1, 1]} : vector<288x256xbf16> to vector<128x256xbf16>
    %c0_9 = arith.constant 0 : index
    %c0_10 = arith.constant 0 : index
    %c0_11 = arith.constant 0 : index
    %14 = vector.load %arg6[%c0_9, %c0_10, %c0_11] : memref<1x128x256xbf16, #tpu.memory_space<vmem>>, vector<1x128x256xbf16>
    %15 = vector.shape_cast %14 : vector<1x128x256xbf16> to vector<128x256xbf16>
    %16 = vector.shape_cast %13 : vector<128x256xbf16> to vector<1x128x256xbf16>
    tpu.vector_store %arg6[%c0_9, %c0_10, %c0_11], %16 {strides = array<i32>} : memref<1x128x256xbf16, #tpu.memory_space<vmem>>, vector<1x128x256xbf16>,
    %17 = vector.extract_strided_slice %8 {offsets = [256, 0], sizes = [32, 256], strides = [1, 1]} : vector<288x256xbf16> to vector<32x256xbf16>
    %c0_12 = arith.constant 0 : index
    %c0_13 = arith.constant 0 : index
    %c0_14 = arith.constant 0 : index
    %18 = vector.load %arg7[%c0_12, %c0_13, %c0_14] : memref<1x32x256xbf16, #tpu.memory_space<vmem>>, vector<1x32x256xbf16>
    %19 = vector.shape_cast %18 : vector<1x32x256xbf16> to vector<32x256xbf16>
    %20 = vector.shape_cast %17 : vector<32x256xbf16> to vector<1x32x256xbf16>
    tpu.vector_store %arg7[%c0_12, %c0_13, %c0_14], %20 {strides = array<i32>} : memref<1x32x256xbf16, #tpu.memory_space<vmem>>, vector<1x32x256xbf16>,
    return
  }
  func.func @transform_0(%arg0: i32, %arg1: i32) -> (i32, i32, i32) {
    %c0_i32 = arith.constant 0 : i32
    %c0_i32_0 = arith.constant 0 : i32
    return %arg0, %c0_i32, %arg1 : i32, i32, i32
  }
  func.func @transform_1(%arg0: i32, %arg1: i32) -> (i32, i32) {
    %c0_i32 = arith.constant 0 : i32
    %c0_i32_0 = arith.constant 0 : i32
    %c0_i32_1 = arith.constant 0 : i32
    return %c0_i32, %c0_i32_0 : i32, i32
  }
  func.func @transform_2(%arg0: i32, %arg1: i32) -> (i32, i32) {
    %c0_i32 = arith.constant 0 : i32
    %c0_i32_0 = arith.constant 0 : i32
    %c0_i32_1 = arith.constant 0 : i32
    return %c0_i32, %c0_i32_0 : i32, i32
  }
  func.func @transform_3(%arg0: i32, %arg1: i32) -> (i32, i32, i32) {
    %c0_i32 = arith.constant 0 : i32
    %c0_i32_0 = arith.constant 0 : i32
    return %arg0, %c0_i32, %arg1 : i32, i32, i32
  }
  func.func @transform_4(%arg0: i32, %arg1: i32) -> (i32, i32, i32) {
    %c0_i32 = arith.constant 0 : i32
    %c0_i32_0 = arith.constant 0 : i32
    return %arg0, %c0_i32, %arg1 : i32, i32, i32
  }
  func.func @transform_5(%arg0: i32, %arg1: i32) -> (i32, i32, i32) {
    %c0_i32 = arith.constant 0 : i32
    %c0_i32_0 = arith.constant 0 : i32
    return %arg0, %c0_i32, %arg1 : i32, i32, i32
  }
}

module attributes {stable_mosaic.version = 11 : i64} {
  func.func @pam_attn_kernel(%arg0: i32, %arg1: i32, %arg2: i32, %arg3: memref<1x128x256xbf16, #tpu.memory_space<vmem>>, %arg4: memref<1x128x256xbf16, #tpu.memory_space<vmem>>, %arg5: memref<1x32x256xbf16, #tpu.memory_space<vmem>>, %arg6: memref<1x32x256xf32, #tpu.memory_space<vmem>>, %arg7: memref<1xf32, #tpu.memory_space<smem>>, %arg8: memref<1x32x256xf32, #tpu.memory_space<vmem>>, %arg9: memref<1x256xf32, #tpu.memory_space<vmem>>, %arg10: memref<1x256xf32, #tpu.memory_space<vmem>>, %arg11: memref<32x256xf32, #tpu.memory_space<vmem>>) attributes {dimension_semantics = [#tpu.dimension_semantics<parallel>, #tpu.dimension_semantics<parallel>, #tpu.dimension_semantics<arbitrary>], iteration_bounds = array<i64: 2, 1, 1>, scalar_prefetch = 0 : i64, scratch_operands = 3 : i64, tpu.core_type = #tpu.core_type<tc>, window_params = [{transform_indices = @transform_0, window_bounds = array<i64: 1, 128, 256>}, {transform_indices = @transform_1, window_bounds = array<i64: 1, 128, 256>}, {transform_indices = @transform_2, window_bounds = array<i64: 1, 32, 256>}, {transform_indices = @transform_3, window_bounds = array<i64: 1, 32, 256>}, {transform_indices = @transform_4, window_bounds = array<i64: 1>}, {transform_indices = @transform_5, window_bounds = array<i64: 1, 32, 256>}]} {
    %c0_i32 = arith.constant 0 : i32
    %0 = arith.cmpi eq, %arg2, %c0_i32 : i32
    %1 = arith.extui %0 : i1 to i32
    %c0_i32_0 = arith.constant 0 : i32
    %2 = arith.cmpi ne, %1, %c0_i32_0 : i32
    scf.if %2 {
      %cst_26 = arith.constant 0xFF800000 : f32
      %36 = vector.broadcast %cst_26 : f32 to vector<1x256xf32>
      %c0_27 = arith.constant 0 : index
      %c0_28 = arith.constant 0 : index
      %37 = vector.load %arg9[%c0_27, %c0_28] : memref<1x256xf32, #tpu.memory_space<vmem>>, vector<1x256xf32>
      tpu.vector_store %arg9[%c0_27, %c0_28], %36 {strides = array<i32>} : memref<1x256xf32, #tpu.memory_space<vmem>>, vector<1x256xf32>,
      %cst_29 = arith.constant 0.000000e+00 : f32
      %38 = vector.broadcast %cst_29 : f32 to vector<1x256xf32>
      %c0_30 = arith.constant 0 : index
      %c0_31 = arith.constant 0 : index
      %39 = vector.load %arg10[%c0_30, %c0_31] : memref<1x256xf32, #tpu.memory_space<vmem>>, vector<1x256xf32>
      tpu.vector_store %arg10[%c0_30, %c0_31], %38 {strides = array<i32>} : memref<1x256xf32, #tpu.memory_space<vmem>>, vector<1x256xf32>,
      %cst_32 = arith.constant 0.000000e+00 : f32
      %40 = vector.broadcast %cst_32 : f32 to vector<32x256xf32>
      %c0_33 = arith.constant 0 : index
      %c0_34 = arith.constant 0 : index
      %41 = vector.load %arg11[%c0_33, %c0_34] : memref<32x256xf32, #tpu.memory_space<vmem>>, vector<32x256xf32>
      tpu.vector_store %arg11[%c0_33, %c0_34], %40 {strides = array<i32>} : memref<32x256xf32, #tpu.memory_space<vmem>>, vector<32x256xf32>,
    } else {
    }
    %c0 = arith.constant 0 : index
    %c0_1 = arith.constant 0 : index
    %c0_2 = arith.constant 0 : index
    %3 = vector.load %arg4[%c0, %c0_1, %c0_2] : memref<1x128x256xbf16, #tpu.memory_space<vmem>>, vector<1x128x256xbf16>
    %4 = vector.shape_cast %3 : vector<1x128x256xbf16> to vector<128x256xbf16>
    %c0_3 = arith.constant 0 : index
    %c0_4 = arith.constant 0 : index
    %c0_5 = arith.constant 0 : index
    %5 = vector.load %arg3[%c0_3, %c0_4, %c0_5] : memref<1x128x256xbf16, #tpu.memory_space<vmem>>, vector<1x128x256xbf16>
    %6 = vector.shape_cast %5 : vector<1x128x256xbf16> to vector<128x256xbf16>
    %cst = arith.constant dense<0.000000e+00> : vector<256x256xf32>
    %7 = tpu.matmul %4, %6, %cst {dimension_numbers = #tpu.dot_dimension_numbers<[0], [0], [1], [1], [0, 1, 1, 1], [], []>} : vector<128x256xbf16>, vector<128x256xbf16>, vector<256x256xf32> -> vector<256x256xf32>
    %c0_6 = arith.constant 0 : index
    %c0_7 = arith.constant 0 : index
    %8 = vector.load %arg9[%c0_6, %c0_7] : memref<1x256xf32, #tpu.memory_space<vmem>>, vector<1x256xf32>
    %cst_8 = arith.constant dense<0xFF800000> : vector<256xf32>
    %9 = vector.multi_reduction <maximumf>, %7, %cst_8 [0] : vector<256x256xf32> to vector<256xf32>
    %10 = vector.shape_cast %9 : vector<256xf32> to vector<1x256xf32>
    %11 = arith.maximumf %8, %10 : vector<1x256xf32>
    %12 = arith.subf %8, %11 : vector<1x256xf32>
    %13 = math.exp %12 : vector<1x256xf32>
    %14 = vector.broadcast %11 : vector<1x256xf32> to vector<256x256xf32>
    %15 = arith.subf %7, %14 : vector<256x256xf32>
    %16 = math.exp %15 : vector<256x256xf32>
    %c0_9 = arith.constant 0 : index
    %c0_10 = arith.constant 0 : index
    %17 = vector.load %arg10[%c0_9, %c0_10] : memref<1x256xf32, #tpu.memory_space<vmem>>, vector<1x256xf32>
    %18 = arith.mulf %13, %17 : vector<1x256xf32>
    %cst_11 = arith.constant dense<0.000000e+00> : vector<256xf32>
    %19 = vector.multi_reduction <add>, %16, %cst_11 [0] : vector<256x256xf32> to vector<256xf32>
    %20 = vector.shape_cast %19 : vector<256xf32> to vector<1x256xf32>
    %21 = arith.addf %18, %20 : vector<1x256xf32>
    %c0_12 = arith.constant 0 : index
    %c0_13 = arith.constant 0 : index
    %22 = vector.load %arg10[%c0_12, %c0_13] : memref<1x256xf32, #tpu.memory_space<vmem>>, vector<1x256xf32>
    tpu.vector_store %arg10[%c0_12, %c0_13], %21 {strides = array<i32>} : memref<1x256xf32, #tpu.memory_space<vmem>>, vector<1x256xf32>,
    %c0_14 = arith.constant 0 : index
    %c0_15 = arith.constant 0 : index
    %23 = vector.load %arg11[%c0_14, %c0_15] : memref<32x256xf32, #tpu.memory_space<vmem>>, vector<32x256xf32>
    %24 = vector.broadcast %13 : vector<1x256xf32> to vector<32x256xf32>
    %25 = arith.mulf %24, %23 : vector<32x256xf32>
    %c0_16 = arith.constant 0 : index
    %c0_17 = arith.constant 0 : index
    %c0_18 = arith.constant 0 : index
    %26 = vector.load %arg5[%c0_16, %c0_17, %c0_18] : memref<1x32x256xbf16, #tpu.memory_space<vmem>>, vector<1x32x256xbf16>
    %27 = vector.shape_cast %26 : vector<1x32x256xbf16> to vector<32x256xbf16>
    %28 = arith.truncf %16 : vector<256x256xf32> to vector<256x256xbf16>
    %cst_19 = arith.constant dense<0.000000e+00> : vector<32x256xf32>
    %29 = tpu.matmul %27, %28, %cst_19 {dimension_numbers = #tpu.dot_dimension_numbers<[1], [0], [0], [1], [0, 0, 1, 1], [], []>} : vector<32x256xbf16>, vector<256x256xbf16>, vector<32x256xf32> -> vector<32x256xf32>
    %30 = arith.addf %25, %29 : vector<32x256xf32>
    %c0_20 = arith.constant 0 : index
    %c0_21 = arith.constant 0 : index
    %31 = vector.load %arg11[%c0_20, %c0_21] : memref<32x256xf32, #tpu.memory_space<vmem>>, vector<32x256xf32>
    tpu.vector_store %arg11[%c0_20, %c0_21], %30 {strides = array<i32>} : memref<32x256xf32, #tpu.memory_space<vmem>>, vector<32x256xf32>,
    %c0_22 = arith.constant 0 : index
    %c0_23 = arith.constant 0 : index
    %32 = vector.load %arg9[%c0_22, %c0_23] : memref<1x256xf32, #tpu.memory_space<vmem>>, vector<1x256xf32>
    tpu.vector_store %arg9[%c0_22, %c0_23], %11 {strides = array<i32>} : memref<1x256xf32, #tpu.memory_space<vmem>>, vector<1x256xf32>,
    %c0_i32_24 = arith.constant 0 : i32
    %33 = arith.cmpi eq, %arg2, %c0_i32_24 : i32
    %34 = arith.extui %33 : i1 to i32
    %c0_i32_25 = arith.constant 0 : i32
    %35 = arith.cmpi ne, %34, %c0_i32_25 : i32
    scf.if %35 {
      %c0_26 = arith.constant 0 : index
      %c0_27 = arith.constant 0 : index
      %36 = vector.load %arg10[%c0_26, %c0_27] : memref<1x256xf32, #tpu.memory_space<vmem>>, vector<1x256xf32>
      %37 = tpu.reciprocal %36 {approx = true} : vector<1x256xf32> -> vector<1x256xf32>
      %c0_28 = arith.constant 0 : index
      %38 = memref.load %arg7[%c0_28] : memref<1xf32, #tpu.memory_space<smem>>
      %c0_29 = arith.constant 0 : index
      %c0_30 = arith.constant 0 : index
      %39 = vector.load %arg11[%c0_29, %c0_30] : memref<32x256xf32, #tpu.memory_space<vmem>>, vector<32x256xf32>
      %40 = vector.broadcast %37 : vector<1x256xf32> to vector<32x256xf32>
      %41 = arith.mulf %39, %40 : vector<32x256xf32>
      %42 = vector.broadcast %38 : f32 to vector<32x256xf32>
      %43 = arith.mulf %42, %41 : vector<32x256xf32>
      %c0_31 = arith.constant 0 : index
      %c0_32 = arith.constant 0 : index
      %c0_33 = arith.constant 0 : index
      %44 = vector.load %arg6[%c0_31, %c0_32, %c0_33] : memref<1x32x256xf32, #tpu.memory_space<vmem>>, vector<1x32x256xf32>
      %45 = vector.shape_cast %44 : vector<1x32x256xf32> to vector<32x256xf32>
      %46 = arith.addf %43, %45 : vector<32x256xf32>
      %c0_34 = arith.constant 0 : index
      %c0_35 = arith.constant 0 : index
      %c0_36 = arith.constant 0 : index
      %47 = vector.load %arg8[%c0_34, %c0_35, %c0_36] : memref<1x32x256xf32, #tpu.memory_space<vmem>>, vector<1x32x256xf32>
      %48 = vector.shape_cast %47 : vector<1x32x256xf32> to vector<32x256xf32>
      %49 = vector.shape_cast %46 : vector<32x256xf32> to vector<1x32x256xf32>
      tpu.vector_store %arg8[%c0_34, %c0_35, %c0_36], %49 {strides = array<i32>} : memref<1x32x256xf32, #tpu.memory_space<vmem>>, vector<1x32x256xf32>,
    } else {
    }
    return
  }
  func.func @transform_0(%arg0: i32, %arg1: i32, %arg2: i32) -> (i32, i32, i32) {
    %c0_i32 = arith.constant 0 : i32
    %c0_i32_0 = arith.constant 0 : i32
    return %arg0, %c0_i32, %arg1 : i32, i32, i32
  }
  func.func @transform_1(%arg0: i32, %arg1: i32, %arg2: i32) -> (i32, i32, i32) {
    %c0_i32 = arith.constant 0 : i32
    %c0_i32_0 = arith.constant 0 : i32
    return %arg0, %c0_i32, %arg2 : i32, i32, i32
  }
  func.func @transform_2(%arg0: i32, %arg1: i32, %arg2: i32) -> (i32, i32, i32) {
    %c0_i32 = arith.constant 0 : i32
    %c0_i32_0 = arith.constant 0 : i32
    return %arg0, %c0_i32, %arg2 : i32, i32, i32
  }
  func.func @transform_3(%arg0: i32, %arg1: i32, %arg2: i32) -> (i32, i32, i32) {
    %c0_i32 = arith.constant 0 : i32
    %c0_i32_0 = arith.constant 0 : i32
    return %arg0, %c0_i32, %arg1 : i32, i32, i32
  }
  func.func @transform_4(%arg0: i32, %arg1: i32, %arg2: i32) -> i32 {
    %c0_i32 = arith.constant 0 : i32
    %c0_i32_0 = arith.constant 0 : i32
    return %c0_i32 : i32
  }
  func.func @transform_5(%arg0: i32, %arg1: i32, %arg2: i32) -> (i32, i32, i32) {
    %c0_i32 = arith.constant 0 : i32
    %c0_i32_0 = arith.constant 0 : i32
    return %arg0, %c0_i32, %arg1 : i32, i32, i32
  }
}

</mosaic_0001>

<bundles_post_ra>
// kernel: pam_module_forward.2
= control target key start
LH: loop header
LB: loop body
LE: loop exit
PB: predicated region body
PF: predicated region fallthrough
CT: control target
= control target key end

     0   :  { %s1604_s18 = smov 0   ;;  %s1606_s19 = smov 0   ;;  %s1950_s0 = inlined_call_operand.vmem [shape: f32[2,32,256], index: 0, kind: input, shape index: {}]   ;;  %s1951_s1 = inlined_call_operand.vmem [shape: bf16[288,32], index: 1, kind: input, shape index: {}]   ;;  %s1952_s2 = inlined_call_operand.vmem [shape: f32[288,1], index: 2, kind: input, shape index: {}]   ;;  %s1953_s3 = inlined_call_operand.vmem [shape: bf16[2,128,256], index: 3, kind: output, shape index: {0}]   ;;  %s1954_s4 = inlined_call_operand.vmem [shape: bf16[2,128,256], index: 4, kind: output, shape index: {1}]   ;;  %s1955_s5 = inlined_call_operand.vmem [shape: bf16[2,32,256], index: 5, kind: output, shape index: {2}]  }
   0x1   :  { %s1608_s20 = smov 0  }
   0x2 LB: > { %s28_s21 = sadd.s32 1, %s1567_s19  ;;  %p1377_p0 = scmp.ge.s32.totalorder %s1571_s20, 1  ;;  %s1571_s20 = sphi %s1608_s20, %s16_s20   ;;  %s1567_s19 = sphi %s1606_s19, %s1957_s19   ;;  %s1563_s18 = sphi %s1604_s18, %s1956_s18  }
   0x3   : > { %p30_p1 = scmp.ge.s32.totalorder %s28_s21, 2  ;;  %p217_p2 = scmp.lt.s32.totalorder %s1571_s20, 3 }
   0x5   : > { %s1959_s21 = smov (%p30_p1, %s28_s21), 0  ;;  %p218_p3 = pnand %p1377_p0, %p217_p2 }
   0x6   : > { %p272_p4 = scmp.lt.s32.totalorder (!%p218_p3), %s1563_s18, 1  ;;  %v1573_v0 = vmov (!%p218_p3), 0   ;;  %v362_v1 = vld [vmem:[%s1952_s2 + $0x10] sm:$0xff] (!%p218_p3)  ;;  %v360_v2 = vld [vmem:[%s1952_s2] sm:$0xff] (!%p218_p3)  ;;  %v363_v14 = vld [vmem:[%s1952_s2 + $0x18] sm:$0xff] (!%p218_p3)  ;;  %vm666_vm0 = vcmask (!%p218_p3), 261120  }
   0x7   : > { %221 = sbr.rel (%p218_p3) target bundleno = 312 (0x138), region = 32  ;;  %753 = vmatprep.mubr.bf16.mxu0 (!%p218_p3), %v1573_v0  ;;  %843 = vmatprep.mubr.bf16.mxu1 (!%p218_p3), %v1573_v0  ;;  %v361_v16 = vld [vmem:[%s1952_s2 + $0x8] sm:$0xff] (!%p218_p3)  ;;  %v1531_v17 = vld [vmem:[%s1951_s1] sm:$0xff] (!%p218_p3)   ;;  %v367_v21 = vld [vmem:[%s1952_s2 + $0x38] sm:$0xff] (!%p218_p3) }
   0x8   : > { %1530 = vset.pattern.permute.xlu1 (!%p218_p3), %v1573_v0  ;;  %1529 = vset.pattern.permute.xlu0 (!%p218_p3), %v1573_v0  ;;  %v1532_v18 = vld [vmem:[%s1951_s1 + $0x48] sm:$0xff] (!%p218_p3)   ;;  %v364_v20 = vld [vmem:[%s1952_s2 + $0x20] sm:$0xff] (!%p218_p3)  ;;  %v366_v22 = vld [vmem:[%s1952_s2 + $0x30] sm:$0xff] (!%p218_p3) }
   0x9   : > { %408 = vperm.xlu1 (!%p218_p3), %1530, %v362_v1   ;;  %398 = vperm.xlu0 (!%p218_p3), %1529, %v360_v2   ;;  %v365_v19 = vld [vmem:[%s1952_s2 + $0x28] sm:$0xff] (!%p218_p3)  ;;  %v1534_v24 = vld [vmem:[%s1951_s1 + $0x50] sm:$0xff] (!%p218_p3)   ;;  %v368_v26 = vld [vmem:[%s1952_s2 + $0x40] sm:$0xff] (!%p218_p3) }
   0xa   : > { %v1533_v23 = vld [vmem:[%s1951_s1 + $0x8] sm:$0xff] (!%p218_p3)   ;;  %v371_v27 = vld [vmem:[%s1952_s2 + $0x58] sm:$0xff] (!%p218_p3)  ;;  %v370_v28 = vld [vmem:[%s1952_s2 + $0x50] sm:$0xff] (!%p218_p3) }
   0xb   : > { %v369_v25 = vld [vmem:[%s1952_s2 + $0x48] sm:$0xff] (!%p218_p3)  ;;  %v1535_v29 = vld [vmem:[%s1951_s1 + $0x10] sm:$0xff] (!%p218_p3)   ;;  %v1536_v30 = vld [vmem:[%s1951_s1 + $0x58] sm:$0xff] (!%p218_p3)  }
   0xc   : > { %v373_v31 = vld [vmem:[%s1952_s2 + $0x68] sm:$0xff] (!%p218_p3)  ;;  %v372_v32 = vld [vmem:[%s1952_s2 + $0x60] sm:$0xff] (!%p218_p3)  ;;  %v375_v33 = vld [vmem:[%s1952_s2 + $0x78] sm:$0xff] (!%p218_p3) }
   0xd   : > { %413 = vperm.xlu1 (!%p218_p3), %1530, %v363_v14   ;;  %403 = vperm.xlu0 (!%p218_p3), %1529, %v361_v16   ;;  %v374_v34 = vld [vmem:[%s1952_s2 + $0x70] sm:$0xff] (!%p218_p3)  ;;  %v1537_v35 = vld [vmem:[%s1951_s1 + $0x18] sm:$0xff] (!%p218_p3)   ;;  %v1538_v36 = vld [vmem:[%s1951_s1 + $0x60] sm:$0xff] (!%p218_p3)  }
   0xe   : > { %s1961_s18 = smov (!%p272_p4, %s1563_s18), 1  ;;  %v377_v37 = vld [vmem:[%s1952_s2 + $0x88] sm:$0xff]  ;;  %v376_v38 = vld [vmem:[%s1952_s2 + $0x80] sm:$0xff]  ;;  %v379_v39 = vld [vmem:[%s1952_s2 + $0x98] sm:$0xff] }
   0xf   : > { %s1460_s22 = sshll.u32 %s1961_s18, 6  ;;  %v378_v40 = vld [vmem:[%s1952_s2 + $0x90] sm:$0xff]  ;;  %v1539_v41 = vld [vmem:[%s1951_s1 + $0x20] sm:$0xff]   ;;  %v1540_v42 = vld [vmem:[%s1951_s1 + $0x68] sm:$0xff]   ;;  %s1463_s11 = sshll.u32 %s1961_s18, 5 }
  0x10   : > { %s279_s29 = scalar_lea.vmem %s1950_s0, %s1460_s22  ;;  %v381_v43 = vld [vmem:[%s1952_s2 + $0xa8] sm:$0xff]  ;;  %v380_v44 = vld [vmem:[%s1952_s2 + $0xa0] sm:$0xff]  ;;  %v383_v45 = vld [vmem:[%s1952_s2 + $0xb8] sm:$0xff]  ;;  %s1925_s14 = scalar_lea.vmem %s1955_s5, %s1463_s11 }
  0x11   : > { %v313_v3 = vld [vmem:[%s279_s29 + $0x8] sm:$0xff]  ;;  %v315_v4 = vld [vmem:[%s279_s29 + $0x18] sm:$0xff]  ;;  %v312_v5 = vld [vmem:[%s279_s29] sm:$0xff]  ;;  %423 = vperm.xlu1 %1530, %v365_v19   ;;  %418 = vperm.xlu0 %1529, %v364_v20  }
  0x12   : > { %v321_v6 = vpack.c.bf16 %v315_v4, %v313_v3  ;;  %v314_v7 = vld [vmem:[%s279_s29 + $0x10] sm:$0xff]  ;;  %v317_v8 = vld [vmem:[%s279_s29 + $0x28] sm:$0xff]  ;;  %v319_v9 = vld [vmem:[%s279_s29 + $0x38] sm:$0xff] }
  0x13   : > { %v320_v10 = vpack.c.bf16 %v314_v7, %v312_v5  ;;  %v323_v11 = vpack.c.bf16 %v319_v9, %v317_v8  ;;  %v316_v12 = vld [vmem:[%s279_s29 + $0x20] sm:$0xff]  ;;  %v318_v13 = vld [vmem:[%s279_s29 + $0x30] sm:$0xff]  ;;  %v1541_v47 = vld [vmem:[%s1951_s1 + $0x28] sm:$0xff]   ;;  %s1461_s29 = sshll.u32 %s1961_s18, 7 }
  0x14   : > { %721 = vmatprep.subr.bf16.mxu0 %v321_v6  ;;  %1500 = vmatprep.subr.bf16.mxu1 %v321_v6  ;;  %v322_v15 = vpack.c.bf16 %v318_v13, %v316_v12  ;;  %v382_v46 = vld [vmem:[%s1952_s2 + $0xb0] sm:$0xff]  ;;  %v385_v49 = vld [vmem:[%s1952_s2 + $0xc8] sm:$0xff]  ;;  %v384_v50 = vld [vmem:[%s1952_s2 + $0xc0] sm:$0xff]  ;;  %s1862_s7 = scalar_lea.vmem %s1953_s3, %s1461_s29  ;;  %s1867_s10 = scalar_lea.vmem %s1954_s4, %s1461_s29 }
  0x15   : > { %722 = vmatpush1.bf16.msra.mxu0 %v320_v10  ;;  %1502 = vmatpush1.bf16.msra.mxu1 %v320_v10  ;;  %v1542_v48 = vld [vmem:[%s1951_s1 + $0x70] sm:$0xff]   ;;  %v387_v51 = vld [vmem:[%s1952_s2 + $0xd8] sm:$0xff]  ;;  %v389_v55 = vld [vmem:[%s1952_s2 + $0xe8] sm:$0xff] }
  0x16   : > { %723 = vmatprep.subr.bf16.mxu0 %v323_v11  ;;  %1501 = vmatprep.subr.bf16.mxu1 %v323_v11  ;;  %v386_v52 = vld [vmem:[%s1952_s2 + $0xd0] sm:$0xff]  ;;  %v1544_v54 = vld [vmem:[%s1951_s1 + $0x78] sm:$0xff]   ;;  %v388_v56 = vld [vmem:[%s1952_s2 + $0xe0] sm:$0xff] }
  0x17   : > { %433 = vperm.xlu1 %1530, %v367_v21   ;;  %428 = vperm.xlu0 %1529, %v366_v22   ;;  %v1543_v53 = vld [vmem:[%s1951_s1 + $0x30] sm:$0xff]   ;;  %v391_v57 = vld [vmem:[%s1952_s2 + $0xf8] sm:$0xff]  ;;  %v1546_v60 = vld [vmem:[%s1951_s1 + $0x80] sm:$0xff]  }
  0x18   : > { %v390_v58 = vld [vmem:[%s1952_s2 + $0xf0] sm:$0xff]  ;;  %v1545_v59 = vld [vmem:[%s1951_s1 + $0x38] sm:$0xff]   ;;  %v393_v61 = vld [vmem:[%s1952_s2 + $0x108] sm:$0xff] }
  0x19   : > { %724 = vmatpush1.bf16.msra.mxu0 %v322_v15  ;;  %1503 = vmatpush1.bf16.msra.mxu1 %v322_v15  ;;  %v392_v62 = vld [vmem:[%s1952_s2 + $0x100] sm:$0xff]  ;;  %v395_v63 = vld [vmem:[%s1952_s2 + $0x118] sm:$0xff]  ;;  %v394_v1 = vld [vmem:[%s1952_s2 + $0x110] sm:$0xff] }
  0x1a   : > { %v1547_v2 = vld [vmem:[%s1951_s1 + $0x40] sm:$0xff]   ;;  %v1548_v3 = vld [vmem:[%s1951_s1 + $0x88] sm:$0xff]  }
  0x1b   : > { %443 = vperm.xlu1 %1530, %v369_v25   ;;  %438 = vperm.xlu0 %1529, %v368_v26  }
  0x1c   : > { %1404 = vmatmul.mubr.msk.bf16.vlgmr.msra.gmra.mrb[0].mxu0 %vm666_vm0, %v1531_v17  ;;  %1413 = vmatmul.mubr.msk.bf16.vlgmr.msra.gmra.mrb[0].mxu1 %vm666_vm0, %v1532_v18 }
  0x1d   : > { %763 = vmatprep.mubr.bf16.mxu0 %v1573_v0  ;;  %853 = vmatprep.mubr.bf16.mxu1 %v1573_v0 }
  0x1f   : > { %453 = vperm.xlu1 %1530, %v371_v27   ;;  %448 = vperm.xlu0 %1529, %v370_v28  }
  0x23   : > { %463 = vperm.xlu1 %1530, %v373_v31   ;;  %458 = vperm.xlu0 %1529, %v372_v32  }
  0x24   : > { %1405 = vmatmul.mubr.msk.bf16.gmra.mrb[4].mxu0 %vm666_vm0, %v1533_v23  ;;  %1414 = vmatmul.mubr.msk.bf16.gmra.mrb[4].mxu1 %vm666_vm0, %v1534_v24 }
  0x25   : > { %773 = vmatprep.mubr.bf16.mxu0 %v1573_v0  ;;  %863 = vmatprep.mubr.bf16.mxu1 %v1573_v0 }
  0x27   : > { %473 = vperm.xlu1 %1530, %v375_v33   ;;  %468 = vperm.xlu0 %1529, %v374_v34  }
  0x2b   : > { %483 = vperm.xlu1 %1530, %v377_v37   ;;  %478 = vperm.xlu0 %1529, %v376_v38  }
  0x2c   : > { %1406 = vmatmul.mubr.msk.bf16.gmra.mrb[8].mxu0 %vm666_vm0, %v1535_v29  ;;  %1415 = vmatmul.mubr.msk.bf16.gmra.mrb[8].mxu1 %vm666_vm0, %v1536_v30 }
  0x2d   : > { %783 = vmatprep.mubr.bf16.mxu0 %v1573_v0  ;;  %873 = vmatprep.mubr.bf16.mxu1 %v1573_v0 }
  0x2f   : > { %493 = vperm.xlu1 %1530, %v379_v39   ;;  %488 = vperm.xlu0 %1529, %v378_v40  }
  0x33   : > { %503 = vperm.xlu1 %1530, %v381_v43   ;;  %498 = vperm.xlu0 %1529, %v380_v44  }
  0x34   : > { %1407 = vmatmul.mubr.msk.bf16.gmra.mrb[12].mxu0 %vm666_vm0, %v1537_v35  ;;  %1416 = vmatmul.mubr.msk.bf16.gmra.mrb[12].mxu1 %vm666_vm0, %v1538_v36 }
  0x35   : > { %793 = vmatprep.mubr.bf16.mxu0 %v1573_v0  ;;  %883 = vmatprep.mubr.bf16.mxu1 %v1573_v0 }
  0x37   : > { %513 = vperm.xlu1 %1530, %v383_v45   ;;  %508 = vperm.xlu0 %1529, %v382_v46  }
  0x3b   : > { %523 = vperm.xlu1 %1530, %v385_v49   ;;  %518 = vperm.xlu0 %1529, %v384_v50  }
  0x3c   : > { %1408 = vmatmul.mubr.msk.bf16.gmra.mrb[16].mxu0 %vm666_vm0, %v1539_v41  ;;  %1417 = vmatmul.mubr.msk.bf16.gmra.mrb[16].mxu1 %vm666_vm0, %v1540_v42 }
  0x3d   : > { %803 = vmatprep.mubr.bf16.mxu0 %v1573_v0  ;;  %893 = vmatprep.mubr.bf16.mxu1 %v1573_v0 }
  0x3f   : > { %533 = vperm.xlu1 %1530, %v387_v51   ;;  %528 = vperm.xlu0 %1529, %v386_v52  }
  0x43   : > { %543 = vperm.xlu1 %1530, %v389_v55   ;;  %538 = vperm.xlu0 %1529, %v388_v56  }
  0x44   : > { %1409 = vmatmul.mubr.msk.bf16.gmra.mrb[20].mxu0 %vm666_vm0, %v1541_v47  ;;  %1418 = vmatmul.mubr.msk.bf16.gmra.mrb[20].mxu1 %vm666_vm0, %v1542_v48 }
  0x45   : > { %813 = vmatprep.mubr.bf16.mxu0 %v1573_v0  ;;  %903 = vmatprep.mubr.bf16.mxu1 %v1573_v0 }
  0x47   : > { %553 = vperm.xlu1 %1530, %v391_v57   ;;  %548 = vperm.xlu0 %1529, %v390_v58  }
  0x4b   : > { %563 = vperm.xlu1 %1530, %v393_v61   ;;  %558 = vperm.xlu0 %1529, %v392_v62  }
  0x4c   : > { %1410 = vmatmul.mubr.msk.bf16.gmra.mrb[24].mxu0 %vm666_vm0, %v1543_v53  ;;  %1419 = vmatmul.mubr.msk.bf16.gmra.mrb[24].mxu1 %vm666_vm0, %v1544_v54 }
  0x4d   : > { %823 = vmatprep.mubr.bf16.mxu0 %v1573_v0  ;;  %913 = vmatprep.mubr.bf16.mxu1 %v1573_v0 }
  0x4f   : > { %573 = vperm.xlu1 %1530, %v395_v63   ;;  %568 = vperm.xlu0 %1529, %v394_v1  }
  0x54   : > { %1411 = vmatmul.mubr.msk.bf16.gmra.mrb[28].mxu0 %vm666_vm0, %v1545_v59  ;;  %1420 = vmatmul.mubr.msk.bf16.gmra.mrb[28].mxu1 %vm666_vm0, %v1546_v60 }
  0x55   : > { %833 = vmatprep.mubr.bf16.mxu0 %v1573_v0  ;;  %923 = vmatprep.mubr.bf16.mxu1 %v1573_v0 }
  0x5c   : > { %1412 = vmatmul.mubr.msk.bf16.gmra.mrb[32].mxu0 %vm666_vm0, %v1547_v2  ;;  %1421 = vmatmul.mubr.msk.bf16.gmra.mrb[32].mxu1 %vm666_vm0, %v1548_v3 }
  0x88   : > { %v409_v4 = vpop.permute.xlu1 %408  ;;  %v399_v5 = vpop.permute.xlu0 %398 }
  0x8c   : > { %v1828_v6 = vpop.permute.xlu1 %413  ;;  %v404_v7 = vpop.permute.xlu0 %403 }
  0x90   : > { %v1830_v0 = vpop.permute.xlu1 %423  ;;  %v1832_v8 = vpop.permute.xlu0 %418 }
  0x96   : > { %v1834_v9 = vpop.permute.xlu1 %433  ;;  %v1836_v10 = vpop.permute.xlu0 %428 }
  0x9a   : > { %v1838_v11 = vpop.permute.xlu1 %443  ;;  %v1840_v12 = vpop.permute.xlu0 %438 }
  0x9e   : > { %v1842_v13 = vpop.permute.xlu1 %453  ;;  %v1844_v14 = vpop.permute.xlu0 %448 }
  0xa2   : > { %v1846_v15 = vpop.permute.xlu1 %463  ;;  %v1848_v16 = vpop.permute.xlu0 %458 }
  0xa6   : > { %v1850_v17 = vpop.permute.xlu1 %473  ;;  %v1852_v18 = vpop.permute.xlu0 %468 }
  0xaa   : > { %v1854_v19 = vpop.permute.xlu1 %483  ;;  %v1856_v20 = vpop.permute.xlu0 %478 }
  0xae   : > { %v494_v21 = vpop.permute.xlu1 %493  ;;  %v489_v22 = vpop.permute.xlu0 %488 }
  0xb2   : > { %v504_v43 = vpop.permute.xlu1 %503  ;;  %v499_v44 = vpop.permute.xlu0 %498 }
  0xb6   : > { %v514_v2 = vpop.permute.xlu1 %513  ;;  %v509_v3 = vpop.permute.xlu0 %508 }
  0xef   : > { %v755_v23 = vpop.f32.mrb[0].mxu0  ;;  %v845_v24 = vpop.f32.mrb[0].mxu1 }
  0xf0   : > { %v756_v25 = vadd.f32 %v755_v23, %v399_v5  ;;  %v846_v26 = vadd.f32 %v845_v24, %v489_v22  ;;  %v757_v27 = vpop.f32.mrb[1].mxu0  ;;  %v847_v28 = vpop.f32.mrb[1].mxu1 }
  0xf1   : > { %v758_v29 = vadd.f32 %v757_v27, %v399_v5  ;;  %v848_v30 = vadd.f32 %v847_v28, %v489_v22  ;;  %v759_v31 = vpop.f32.mrb[2].mxu0  ;;  %v849_v32 = vpop.f32.mrb[2].mxu1 }
  0xf2   : > { %v760_v33 = vadd.f32 %v759_v31, %v404_v7  ;;  %v850_v34 = vadd.f32 %v849_v32, %v494_v21  ;;  %v761_v35 = vpop.f32.mrb[3].mxu0  ;;  %v851_v36 = vpop.f32.mrb[3].mxu1 }
  0xf3   : > { %v1464_v37 = vpack.c.bf16 %v758_v29, %v756_v25  ;;  %v1482_v38 = vpack.c.bf16 %v848_v30, %v846_v26  ;;  %v762_v39 = vadd.f32 %v761_v35, %v404_v7  ;;  %v852_v40 = vadd.f32 %v851_v36, %v494_v21 }
  0xf5   : > { %1050 = vst [vmem:[%s1862_s7] sm:$0xff] %v1464_v37  ;;  %1148 = vst [vmem:[%s1867_s10 + $0x10] sm:$0xff] %v1482_v38  ;;  %v1465_v41 = vpack.c.bf16 %v762_v39, %v760_v33  ;;  %v1483_v42 = vpack.c.bf16 %v852_v40, %v850_v34  ;;  %v519_v37 = vpop.permute.xlu0 %518 }
  0xf7   : > { %1051 = vst [vmem:[%s1862_s7 + $0x8] sm:$0xff] %v1465_v41  ;;  %1149 = vst [vmem:[%s1867_s10 + $0x18] sm:$0xff] %v1483_v42  ;;  %v765_v45 = vpop.f32.mrb[4].mxu0  ;;  %v855_v46 = vpop.f32.mrb[4].mxu1 }
  0xf8   : > { %v766_v47 = vadd.f32 %v765_v45, %v409_v4  ;;  %v856_v48 = vadd.f32 %v855_v46, %v499_v44  ;;  %v767_v49 = vpop.f32.mrb[5].mxu0  ;;  %v857_v50 = vpop.f32.mrb[5].mxu1 }
  0xf9   : > { %v768_v51 = vadd.f32 %v767_v49, %v409_v4  ;;  %v858_v52 = vadd.f32 %v857_v50, %v499_v44  ;;  %v769_v53 = vpop.f32.mrb[6].mxu0  ;;  %v859_v54 = vpop.f32.mrb[6].mxu1 }
  0xfa   : > { %v770_v55 = vadd.f32 %v769_v53, %v1828_v6  ;;  %v860_v56 = vadd.f32 %v859_v54, %v504_v43  ;;  %v771_v57 = vpop.f32.mrb[7].mxu0  ;;  %v861_v58 = vpop.f32.mrb[7].mxu1 }
  0xfb   : > { %v1466_v59 = vpack.c.bf16 %v768_v51, %v766_v47  ;;  %v1484_v60 = vpack.c.bf16 %v858_v52, %v856_v48  ;;  %v772_v61 = vadd.f32 %v771_v57, %v1828_v6  ;;  %v862_v62 = vadd.f32 %v861_v58, %v504_v43  ;;  %v529_v57 = vpop.permute.xlu0 %528 }
  0xfd   : > { %1052 = vst [vmem:[%s1862_s7 + $0x10] sm:$0xff] %v1466_v59  ;;  %1150 = vst [vmem:[%s1867_s10 + $0x20] sm:$0xff] %v1484_v60  ;;  %v1467_v63 = vpack.c.bf16 %v772_v61, %v770_v55  ;;  %v1485_v1 = vpack.c.bf16 %v862_v62, %v860_v56 }
  0xff   : > { %1053 = vst [vmem:[%s1862_s7 + $0x18] sm:$0xff] %v1467_v63  ;;  %1151 = vst [vmem:[%s1867_s10 + $0x28] sm:$0xff] %v1485_v1  ;;  %v775_v4 = vpop.f32.mrb[8].mxu0  ;;  %v865_v5 = vpop.f32.mrb[8].mxu1 }
 0x100   : > { %v776_v7 = vadd.f32 %v775_v4, %v1832_v8  ;;  %v866_v21 = vadd.f32 %v865_v5, %v509_v3  ;;  %v777_v22 = vpop.f32.mrb[9].mxu0  ;;  %v867_v23 = vpop.f32.mrb[9].mxu1 }
 0x101   : > { %v778_v6 = vadd.f32 %v777_v22, %v1832_v8  ;;  %v868_v24 = vadd.f32 %v867_v23, %v509_v3  ;;  %v779_v25 = vpop.f32.mrb[10].mxu0  ;;  %v869_v26 = vpop.f32.mrb[10].mxu1 }
 0x102   : > { %v780_v27 = vadd.f32 %v779_v25, %v1830_v0  ;;  %v870_v28 = vadd.f32 %v869_v26, %v514_v2  ;;  %v781_v29 = vpop.f32.mrb[11].mxu0  ;;  %v871_v30 = vpop.f32.mrb[11].mxu1 }
 0x103   : > { %v1468_v31 = vpack.c.bf16 %v778_v6, %v776_v7  ;;  %v1486_v32 = vpack.c.bf16 %v868_v24, %v866_v21  ;;  %v782_v33 = vadd.f32 %v781_v29, %v1830_v0  ;;  %v872_v34 = vadd.f32 %v871_v30, %v514_v2  ;;  %v524_v8 = vpop.permute.xlu1 %523 }
 0x105   : > { %1054 = vst [vmem:[%s1862_s7 + $0x20] sm:$0xff] %v1468_v31  ;;  %1152 = vst [vmem:[%s1867_s10 + $0x30] sm:$0xff] %v1486_v32  ;;  %v1469_v35 = vpack.c.bf16 %v782_v33, %v780_v27  ;;  %v1487_v36 = vpack.c.bf16 %v872_v34, %v870_v28  ;;  %v539_v27 = vpop.permute.xlu0 %538 }
 0x107   : > { %1055 = vst [vmem:[%s1862_s7 + $0x28] sm:$0xff] %v1469_v35  ;;  %1153 = vst [vmem:[%s1867_s10 + $0x38] sm:$0xff] %v1487_v36  ;;  %v785_v38 = vpop.f32.mrb[12].mxu0  ;;  %v875_v39 = vpop.f32.mrb[12].mxu1 }
 0x108   : > { %v786_v40 = vadd.f32 %v785_v38, %v1836_v10  ;;  %v876_v41 = vadd.f32 %v875_v39, %v519_v37  ;;  %v787_v42 = vpop.f32.mrb[13].mxu0  ;;  %v877_v43 = vpop.f32.mrb[13].mxu1 }
 0x109   : > { %v788_v0 = vadd.f32 %v787_v42, %v1836_v10  ;;  %v878_v44 = vadd.f32 %v877_v43, %v519_v37  ;;  %v789_v45 = vpop.f32.mrb[14].mxu0  ;;  %v879_v46 = vpop.f32.mrb[14].mxu1 }
 0x10a   : > { %v790_v47 = vadd.f32 %v789_v45, %v1834_v9  ;;  %v880_v48 = vadd.f32 %v879_v46, %v524_v8  ;;  %v791_v49 = vpop.f32.mrb[15].mxu0  ;;  %v881_v50 = vpop.f32.mrb[15].mxu1 }
 0x10b   : > { %v1470_v51 = vpack.c.bf16 %v788_v0, %v786_v40  ;;  %v1488_v52 = vpack.c.bf16 %v878_v44, %v876_v41  ;;  %v792_v53 = vadd.f32 %v791_v49, %v1834_v9  ;;  %v882_v54 = vadd.f32 %v881_v50, %v524_v8  ;;  %v534_v10 = vpop.permute.xlu1 %533  ;;  %v549_v45 = vpop.permute.xlu0 %548 }
 0x10d   : > { %1056 = vst [vmem:[%s1862_s7 + $0x30] sm:$0xff] %v1470_v51  ;;  %1154 = vst [vmem:[%s1867_s10 + $0x40] sm:$0xff] %v1488_v52  ;;  %v1471_v55 = vpack.c.bf16 %v792_v53, %v790_v47  ;;  %v1489_v56 = vpack.c.bf16 %v882_v54, %v880_v48 }
 0x10f   : > { %1057 = vst [vmem:[%s1862_s7 + $0x38] sm:$0xff] %v1471_v55  ;;  %1155 = vst [vmem:[%s1867_s10 + $0x48] sm:$0xff] %v1489_v56  ;;  %v795_v58 = vpop.f32.mrb[16].mxu0  ;;  %v885_v59 = vpop.f32.mrb[16].mxu1 }
 0x110   : > { %v796_v60 = vadd.f32 %v795_v58, %v1840_v12  ;;  %v886_v61 = vadd.f32 %v885_v59, %v529_v57  ;;  %v797_v62 = vpop.f32.mrb[17].mxu0  ;;  %v887_v63 = vpop.f32.mrb[17].mxu1 }
 0x111   : > { %v798_v9 = vadd.f32 %v797_v62, %v1840_v12  ;;  %v888_v1 = vadd.f32 %v887_v63, %v529_v57  ;;  %v799_v2 = vpop.f32.mrb[18].mxu0  ;;  %v889_v3 = vpop.f32.mrb[18].mxu1 }
 0x112   : > { %v800_v4 = vadd.f32 %v799_v2, %v1838_v11  ;;  %v890_v5 = vadd.f32 %v889_v3, %v534_v10  ;;  %v801_v7 = vpop.f32.mrb[19].mxu0  ;;  %v891_v21 = vpop.f32.mrb[19].mxu1 }
 0x113   : > { %v1472_v22 = vpack.c.bf16 %v798_v9, %v796_v60  ;;  %v1490_v23 = vpack.c.bf16 %v888_v1, %v886_v61  ;;  %v802_v6 = vadd.f32 %v801_v7, %v1838_v11  ;;  %v892_v24 = vadd.f32 %v891_v21, %v534_v10  ;;  %v544_v12 = vpop.permute.xlu1 %543  ;;  %v559_v9 = vpop.permute.xlu0 %558 }
 0x115   : > { %1058 = vst [vmem:[%s1862_s7 + $0x40] sm:$0xff] %v1472_v22  ;;  %1156 = vst [vmem:[%s1867_s10 + $0x50] sm:$0xff] %v1490_v23  ;;  %v1473_v25 = vpack.c.bf16 %v802_v6, %v800_v4  ;;  %v1491_v26 = vpack.c.bf16 %v892_v24, %v890_v5 }
 0x117   : > { %1059 = vst [vmem:[%s1862_s7 + $0x48] sm:$0xff] %v1473_v25  ;;  %1157 = vst [vmem:[%s1867_s10 + $0x58] sm:$0xff] %v1491_v26  ;;  %v805_v28 = vpop.f32.mrb[20].mxu0  ;;  %v895_v29 = vpop.f32.mrb[20].mxu1 }
 0x118   : > { %v806_v30 = vadd.f32 %v805_v28, %v1844_v14  ;;  %v896_v31 = vadd.f32 %v895_v29, %v539_v27  ;;  %v807_v32 = vpop.f32.mrb[21].mxu0  ;;  %v897_v33 = vpop.f32.mrb[21].mxu1 }
 0x119   : > { %v808_v11 = vadd.f32 %v807_v32, %v1844_v14  ;;  %v898_v34 = vadd.f32 %v897_v33, %v539_v27  ;;  %v809_v35 = vpop.f32.mrb[22].mxu0  ;;  %v899_v36 = vpop.f32.mrb[22].mxu1 }
 0x11a   : > { %v810_v8 = vadd.f32 %v809_v35, %v1842_v13  ;;  %v900_v37 = vadd.f32 %v899_v36, %v544_v12  ;;  %v811_v38 = vpop.f32.mrb[23].mxu0  ;;  %v901_v39 = vpop.f32.mrb[23].mxu1 }
 0x11b   : > { %v1474_v40 = vpack.c.bf16 %v808_v11, %v806_v30  ;;  %v1492_v41 = vpack.c.bf16 %v898_v34, %v896_v31  ;;  %v812_v42 = vadd.f32 %v811_v38, %v1842_v13  ;;  %v902_v43 = vadd.f32 %v901_v39, %v544_v12  ;;  %v554_v14 = vpop.permute.xlu1 %553  ;;  %v569_v32 = vpop.permute.xlu0 %568 }
 0x11d   : > { %1060 = vst [vmem:[%s1862_s7 + $0x50] sm:$0xff] %v1474_v40  ;;  %1158 = vst [vmem:[%s1867_s10 + $0x60] sm:$0xff] %v1492_v41  ;;  %v1475_v0 = vpack.c.bf16 %v812_v42, %v810_v8  ;;  %v1493_v44 = vpack.c.bf16 %v902_v43, %v900_v37 }
 0x11f   : > { %1061 = vst [vmem:[%s1862_s7 + $0x58] sm:$0xff] %v1475_v0  ;;  %1159 = vst [vmem:[%s1867_s10 + $0x68] sm:$0xff] %v1493_v44  ;;  %v815_v46 = vpop.f32.mrb[24].mxu0  ;;  %v905_v47 = vpop.f32.mrb[24].mxu1 }
 0x120   : > { %v816_v48 = vadd.f32 %v815_v46, %v1848_v16  ;;  %v906_v49 = vadd.f32 %v905_v47, %v549_v45  ;;  %v817_v50 = vpop.f32.mrb[25].mxu0  ;;  %v907_v51 = vpop.f32.mrb[25].mxu1 }
 0x121   : > { %v818_v13 = vadd.f32 %v817_v50, %v1848_v16  ;;  %v908_v52 = vadd.f32 %v907_v51, %v549_v45  ;;  %v819_v53 = vpop.f32.mrb[26].mxu0  ;;  %v909_v54 = vpop.f32.mrb[26].mxu1 }
 0x122   : > { %v820_v55 = vadd.f32 %v819_v53, %v1846_v15  ;;  %v910_v56 = vadd.f32 %v909_v54, %v554_v14  ;;  %v821_v10 = vpop.f32.mrb[27].mxu0  ;;  %v911_v57 = vpop.f32.mrb[27].mxu1 }
 0x123   : > { %v1476_v58 = vpack.c.bf16 %v818_v13, %v816_v48  ;;  %v1494_v59 = vpack.c.bf16 %v908_v52, %v906_v49  ;;  %v822_v60 = vadd.f32 %v821_v10, %v1846_v15  ;;  %v912_v61 = vadd.f32 %v911_v57, %v554_v14  ;;  %v564_v63 = vpop.permute.xlu1 %563 }
 0x125   : > { %1062 = vst [vmem:[%s1862_s7 + $0x60] sm:$0xff] %v1476_v58  ;;  %1160 = vst [vmem:[%s1867_s10 + $0x70] sm:$0xff] %v1494_v59  ;;  %v1477_v62 = vpack.c.bf16 %v822_v60, %v820_v55  ;;  %v1495_v16 = vpack.c.bf16 %v912_v61, %v910_v56 }
 0x127   : > { %1063 = vst [vmem:[%s1862_s7 + $0x68] sm:$0xff] %v1477_v62  ;;  %1161 = vst [vmem:[%s1867_s10 + $0x78] sm:$0xff] %v1495_v16  ;;  %v825_v1 = vpop.f32.mrb[28].mxu0  ;;  %v915_v2 = vpop.f32.mrb[28].mxu1 }
 0x128   : > { %v826_v3 = vadd.f32 %v825_v1, %v1852_v18  ;;  %v916_v4 = vadd.f32 %v915_v2, %v559_v9  ;;  %v827_v5 = vpop.f32.mrb[29].mxu0  ;;  %v917_v7 = vpop.f32.mrb[29].mxu1 }
 0x129   : > { %v828_v15 = vadd.f32 %v827_v5, %v1852_v18  ;;  %v918_v21 = vadd.f32 %v917_v7, %v559_v9  ;;  %v829_v22 = vpop.f32.mrb[30].mxu0  ;;  %v919_v23 = vpop.f32.mrb[30].mxu1 }
 0x12a   : > { %v830_v6 = vadd.f32 %v829_v22, %v1850_v17  ;;  %v920_v24 = vadd.f32 %v919_v23, %v564_v63  ;;  %v831_v25 = vpop.f32.mrb[31].mxu0  ;;  %v921_v26 = vpop.f32.mrb[31].mxu1 }
 0x12b   : > { %v1478_v12 = vpack.c.bf16 %v828_v15, %v826_v3  ;;  %v1496_v27 = vpack.c.bf16 %v918_v21, %v916_v4  ;;  %v832_v18 = vadd.f32 %v831_v25, %v1850_v17  ;;  %v922_v28 = vadd.f32 %v921_v26, %v564_v63  ;;  %v574_v31 = vpop.permute.xlu1 %573 }
 0x12d   : > { %1064 = vst [vmem:[%s1862_s7 + $0x70] sm:$0xff] %v1478_v12  ;;  %1182 = vst [vmem:[%s1925_s14] sm:$0xff] %v1496_v27  ;;  %v1479_v29 = vpack.c.bf16 %v832_v18, %v830_v6  ;;  %v1497_v30 = vpack.c.bf16 %v922_v28, %v920_v24 }
 0x12f   : > { %1065 = vst [vmem:[%s1862_s7 + $0x78] sm:$0xff] %v1479_v29  ;;  %1183 = vst [vmem:[%s1925_s14 + $0x8] sm:$0xff] %v1497_v30  ;;  %v835_v33 = vpop.f32.mrb[32].mxu0  ;;  %v925_v11 = vpop.f32.mrb[32].mxu1 }
 0x130   : > { %v836_v34 = vadd.f32 %v835_v33, %v1856_v20  ;;  %v926_v35 = vadd.f32 %v925_v11, %v569_v32  ;;  %v837_v36 = vpop.f32.mrb[33].mxu0  ;;  %v927_v8 = vpop.f32.mrb[33].mxu1 }
 0x131   : > { %v838_v17 = vadd.f32 %v837_v36, %v1856_v20  ;;  %v928_v37 = vadd.f32 %v927_v8, %v569_v32  ;;  %v839_v38 = vpop.f32.mrb[34].mxu0  ;;  %v929_v39 = vpop.f32.mrb[34].mxu1 }
 0x132   : > { %v840_v40 = vadd.f32 %v839_v38, %v1854_v19  ;;  %v930_v41 = vadd.f32 %v929_v39, %v574_v31  ;;  %v841_v42 = vpop.f32.mrb[35].mxu0  ;;  %v931_v43 = vpop.f32.mrb[35].mxu1 }
 0x133   : > { %v1480_v0 = vpack.c.bf16 %v838_v17, %v836_v34  ;;  %v1498_v44 = vpack.c.bf16 %v928_v37, %v926_v35  ;;  %v842_v14 = vadd.f32 %v841_v42, %v1854_v19  ;;  %v932_v45 = vadd.f32 %v931_v43, %v574_v31 }
 0x135   : > { %1146 = vst [vmem:[%s1867_s10] sm:$0xff] %v1480_v0  ;;  %1184 = vst [vmem:[%s1925_s14 + $0x10] sm:$0xff] %v1498_v44  ;;  %v1481_v46 = vpack.c.bf16 %v842_v14, %v840_v40  ;;  %v1499_v47 = vpack.c.bf16 %v932_v45, %v930_v41 }
 0x137   : > { %1147 = vst [vmem:[%s1867_s10 + $0x8] sm:$0xff] %v1481_v46  ;;  %1185 = vst [vmem:[%s1925_s14 + $0x18] sm:$0xff] %v1499_v47 }
 0x138 PF: > { %s16_s20 = sadd.s32 1, %s1571_s20   ;;  %s1956_s18 = smov %s1567_s19 }
 0x139   : > { %p13_p5 = scmp.ge.s32.totalorder %s16_s20, 4   ;;  %s1957_s19 = smov %s1959_s21 }
 0x13b   :  { %15 = sbr.rel (!%p13_p5) target bundleno = 2 (0x2), region = 86 }

// kernel: pam_module_forward.3
= control target key start
LH: loop header
LB: loop body
LE: loop exit
PB: predicated region body
PF: predicated region fallthrough
CT: control target
= control target key end

     0   :  { %s1912_s20 = smov 0   ;;  %s1914_s21 = smov 0   ;;  %s2632_s0 = inlined_call_operand.vmem [shape: bf16[2,128,256], index: 0, kind: input, shape index: {}]   ;;  %s2633_s1 = inlined_call_operand.vmem [shape: bf16[2,128,256], index: 1, kind: input, shape index: {}]   ;;  %s2634_s2 = inlined_call_operand.vmem [shape: bf16[2,32,256], index: 2, kind: input, shape index: {}]   ;;  %s2635_s3 = inlined_call_operand.vmem [shape: f32[2,32,256], index: 3, kind: input, shape index: {}]   ;;  %s2636_s4 = inlined_call_operand.<no memory space> [shape: f32[1], index: 4, kind: input, shape index: {}]   ;;  %s2637_s5 = inlined_call_operand.vmem [shape: f32[2,32,256], index: 5, kind: output, shape index: {}]  }
   0x1   :  { %10 = sst [smem:[#allocation5]] %s2636_s4  ;;  %s1916_s22 = smov 0  }
   0x2 LB: > { %s35_s4 = sadd.s32 1, %s1869_s21  ;;  %p1583_p0 = scmp.ge.s32.totalorder %s1873_s22, 1  ;;  %s1873_s22 = sphi %s1916_s22, %s16_s22   ;;  %s1869_s21 = sphi %s1914_s21, %s2837_s21   ;;  %s1865_s20 = sphi %s1912_s20, %s2836_s20  }
   0x3   : > { %p37_p1 = scmp.ge.s32.totalorder %s35_s4, 2  ;;  %p267_p2 = scmp.lt.s32.totalorder %s1873_s22, 3 }
   0x5   : > { %s2839_s4 = smov (%p37_p1, %s35_s4), 0  ;;  %p268_p3 = pnand %p1583_p0, %p267_p2 }
   0x7   : > { %271 = sbr.rel (%p268_p3) target bundleno = 801 (0x321), region = 40 }
   0xe   : > { %p331_p4 = scmp.lt.s32.totalorder %s1865_s20, 1  ;;  %v1875_v0 = vmov 0   ;;  %v2638_v53 = vlaneseq  ;;  %v2696_v57 = vmov 0  ;;  %v1876_v60 = vmov -inf   ;;  %s1374_s9 = sld [smem:[#allocation5]] }
   0xf   : > { %655 = vmatprep.mubr.bf16.mxu0 %v1875_v0  ;;  %v1877_v61 = vmov 0.0  }
  0x10   : > { %s2841_s20 = smov (!%p331_p4, %s1865_s20), 1  ;;  %vm2006_vm0 = vcmp.lt.s32.totalorder %v2638_v53, 256 }
  0x11   : > { %s1632_s23 = sshll.u32 %s2841_s20, 7  ;;  %v2697_v57 = vsel %vm2006_vm0, 4294967295, %v2696_v57  ;;  %389 = vst.msk [vmem:[#allocation2] sm:$0x3] %vm2006_vm0, %v1876_v60  ;;  %390 = vst.msk [vmem:[#allocation3] sm:$0x3] %vm2006_vm0, %v1877_v61 }
  0x12   : > { %s1937_s26 = scalar_lea.vmem %s2633_s1, %s1632_s23  ;;  %s1945_s29 = scalar_lea.vmem %s2632_s0, %s1632_s23  ;;  %2698 = vst [vmem:[#allocation6_spill] sm:$0xff] %v2697_v57 }
  0x13   : > { %v1665_v1 = vld [vmem:[%s1937_s26] ss:$8 sps:$4 sm:$0xff]   ;;  %v1667_v2 = vld [vmem:[%s1937_s26 + $0x10] ss:$8 sps:$4 sm:$0xff]   ;;  %v1681_v5 = vld [vmem:[%s1937_s26 + $0x4] ss:$8 sps:$4 sm:$0xff]  }
  0x14   : > { %511 = vxpose.xlu0.c.b16.start [1/8] %v1665_v1, 128  ;;  %v1669_v3 = vld [vmem:[%s1937_s26 + $0x20] ss:$8 sps:$4 sm:$0xff]   ;;  %v1671_v4 = vld [vmem:[%s1937_s26 + $0x30] ss:$8 sps:$4 sm:$0xff]   ;;  %v1682_v6 = vld [vmem:[%s1937_s26 + $0x14] ss:$8 sps:$4 sm:$0xff]   ;;  %527 = vxpose.xlu1.c.b16.start [1/8] %v1681_v5, 128 }
  0x15   : > { %v1683_v7 = vld [vmem:[%s1945_s29 + $0x4] ss:$8 sps:$4 sm:$0xff]   ;;  %v1686_v8 = vld [vmem:[%s1945_s29] ss:$8 sps:$4 sm:$0xff]   ;;  %v1687_v9 = vld [vmem:[%s1945_s29 + $0x14] ss:$8 sps:$4 sm:$0xff]  }
  0x16   : > { %623 = vmatprep.subr.bf16.mxu0 %v1683_v7  ;;  %v1690_v10 = vld [vmem:[%s1945_s29 + $0x10] ss:$8 sps:$4 sm:$0xff]   ;;  %v1691_v11 = vld [vmem:[%s1945_s29 + $0x24] ss:$8 sps:$4 sm:$0xff]   ;;  %v1673_v12 = vld [vmem:[%s1937_s26 + $0x40] ss:$8 sps:$4 sm:$0xff]  }
  0x17   : > { %624 = vmatpush1.bf16.msra.mxu0 %v1686_v8  ;;  %v1685_v13 = vld [vmem:[%s1937_s26 + $0x24] ss:$8 sps:$4 sm:$0xff]   ;;  %v1694_v14 = vld [vmem:[%s1945_s29 + $0x20] ss:$8 sps:$4 sm:$0xff]   ;;  %v1695_v15 = vld [vmem:[%s1945_s29 + $0x34] ss:$8 sps:$4 sm:$0xff]  }
  0x18   : > { %512 = vxpose.xlu0.c.b16.cont [2/8] %v1667_v2, 128  ;;  %625 = vmatprep.subr.bf16.mxu0 %v1687_v9  ;;  %v1675_v16 = vld [vmem:[%s1937_s26 + $0x50] ss:$8 sps:$4 sm:$0xff]   ;;  %v1689_v17 = vld [vmem:[%s1937_s26 + $0x34] ss:$8 sps:$4 sm:$0xff]   ;;  %v1699_v19 = vld [vmem:[%s1945_s29 + $0x44] ss:$8 sps:$4 sm:$0xff]  }
  0x19   : > { %528 = vxpose.xlu1.c.b16.cont [2/8] %v1682_v6, 128  ;;  %v1698_v18 = vld [vmem:[%s1945_s29 + $0x30] ss:$8 sps:$4 sm:$0xff]   ;;  %v1677_v20 = vld [vmem:[%s1937_s26 + $0x60] ss:$8 sps:$4 sm:$0xff]   ;;  %v1693_v21 = vld [vmem:[%s1937_s26 + $0x44] ss:$8 sps:$4 sm:$0xff]  }
  0x1a   : > { %v1702_v22 = vld [vmem:[%s1945_s29 + $0x40] ss:$8 sps:$4 sm:$0xff]   ;;  %v1703_v23 = vld [vmem:[%s1945_s29 + $0x54] ss:$8 sps:$4 sm:$0xff]   ;;  %v1679_v24 = vld [vmem:[%s1937_s26 + $0x70] ss:$8 sps:$4 sm:$0xff]  }
  0x1b   : > { %626 = vmatpush1.bf16.msra.mxu0 %v1690_v10  ;;  %v1697_v25 = vld [vmem:[%s1937_s26 + $0x54] ss:$8 sps:$4 sm:$0xff]   ;;  %v1706_v26 = vld [vmem:[%s1945_s29 + $0x50] ss:$8 sps:$4 sm:$0xff]   ;;  %v1707_v27 = vld [vmem:[%s1945_s29 + $0x64] ss:$8 sps:$4 sm:$0xff]  }
  0x1c   : > { %513 = vxpose.xlu0.c.b16.cont [3/8] %v1669_v3, 128  ;;  %627 = vmatprep.subr.bf16.mxu0 %v1691_v11  ;;  %v1701_v28 = vld [vmem:[%s1937_s26 + $0x64] ss:$8 sps:$4 sm:$0xff]   ;;  %v1709_v29 = vld [vmem:[%s1945_s29 + $0x60] ss:$8 sps:$4 sm:$0xff]   ;;  %v1710_v30 = vld [vmem:[%s1945_s29 + $0x74] ss:$8 sps:$4 sm:$0xff]  }
  0x1d   : > { %529 = vxpose.xlu1.c.b16.cont [3/8] %v1685_v13, 128  ;;  %v1705_v31 = vld [vmem:[%s1937_s26 + $0x74] ss:$8 sps:$4 sm:$0xff]   ;;  %v1712_v32 = vld [vmem:[%s1945_s29 + $0x70] ss:$8 sps:$4 sm:$0xff]   ;;  %s1634_s30 = sshll.u32 %s2841_s20, 5  ;;  %s1635_s10 = sshll.u32 %s2841_s20, 6 }
  0x1e   : > { %s2202_s8 = scalar_lea.vmem %s2634_s2, %s1634_s30  ;;  %s2598_s13 = scalar_lea.vmem %s2635_s3, %s1635_s10 }
  0x1f   : > { %628 = vmatpush1.bf16.msra.mxu0 %v1694_v14  ;;  %s2607_s16 = scalar_lea.vmem %s2637_s5, %s1635_s10 }
  0x20   : > { %514 = vxpose.xlu0.c.b16.cont [4/8] %v1671_v4, 128  ;;  %629 = vmatprep.subr.bf16.mxu0 %v1695_v15 }
  0x21   : > { %530 = vxpose.xlu1.c.b16.cont [4/8] %v1689_v17, 128 }
  0x23   : > { %630 = vmatpush1.bf16.msra.mxu0 %v1698_v18 }
  0x24   : > { %515 = vxpose.xlu0.c.b16.cont [5/8] %v1673_v12, 128  ;;  %631 = vmatprep.subr.bf16.mxu0 %v1699_v19 }
  0x25   : > { %531 = vxpose.xlu1.c.b16.cont [5/8] %v1693_v21, 128 }
  0x27   : > { %632 = vmatpush1.bf16.msra.mxu0 %v1702_v22 }
  0x28   : > { %516 = vxpose.xlu0.c.b16.cont [6/8] %v1675_v16, 128  ;;  %633 = vmatprep.subr.bf16.mxu0 %v1703_v23 }
  0x29   : > { %532 = vxpose.xlu1.c.b16.cont [6/8] %v1697_v25, 128 }
  0x2b   : > { %634 = vmatpush1.bf16.msra.mxu0 %v1706_v26 }
  0x2c   : > { %517 = vxpose.xlu0.c.b16.cont [7/8] %v1677_v20, 128  ;;  %635 = vmatprep.subr.bf16.mxu0 %v1707_v27 }
  0x2d   : > { %533 = vxpose.xlu1.c.b16.cont [7/8] %v1701_v28, 128 }
  0x2f   : > { %636 = vmatpush1.bf16.msra.mxu0 %v1709_v29 }
  0x30   : > { %518 = vxpose.xlu0.c.b16.end [8/8] %v1679_v24, 128  ;;  %637 = vmatprep.subr.bf16.mxu0 %v1710_v30 }
  0x31   : > { %534 = vxpose.xlu1.c.b16.end [8/8] %v1705_v31, 128 }
  0x33   : > { %638 = vmatpush1.bf16.msra.mxu0 %v1712_v32 }
  0x7a   : > { %v519_v33 = vpop.trf.xlu0 }
  0x7b   : > { %656 = vmatmul.mubr.bf16.vlgmr.msra.gmra.mrb[0].mxu0 %v519_v33  ;;  %v535_v41 = vpop.trf.xlu1 }
  0x7c   : > { %665 = vmatprep.mubr.bf16.mxu0 %v1875_v0 }
  0x7e   : > { %v520_v34 = vpop.trf.xlu0 }
  0x7f   : > { %v536_v42 = vpop.trf.xlu1 }
  0x82   : > { %v521_v35 = vpop.trf.xlu0 }
  0x83   : > { %666 = vmatmul.mubr.bf16.gmra.mrb[4].mxu0 %v520_v34  ;;  %v537_v43 = vpop.trf.xlu1 }
  0x84   : > { %675 = vmatprep.mubr.bf16.mxu0 %v1875_v0 }
  0x86   : > { %v522_v36 = vpop.trf.xlu0 }
  0x87   : > { %v538_v44 = vpop.trf.xlu1 }
  0x8a   : > { %v523_v37 = vpop.trf.xlu0 }
  0x8b   : > { %676 = vmatmul.mubr.bf16.gmra.mrb[8].mxu0 %v521_v35  ;;  %v539_v45 = vpop.trf.xlu1 }
  0x8c   : > { %685 = vmatprep.mubr.bf16.mxu0 %v1875_v0 }
  0x8e   : > { %v524_v38 = vpop.trf.xlu0 }
  0x8f   : > { %v540_v46 = vpop.trf.xlu1 }
  0x92   : > { %v525_v39 = vpop.trf.xlu0 }
  0x93   : > { %686 = vmatmul.mubr.bf16.gmra.mrb[12].mxu0 %v522_v36  ;;  %v541_v47 = vpop.trf.xlu1 }
  0x94   : > { %695 = vmatprep.mubr.bf16.mxu0 %v1875_v0 }
  0x96   : > { %v526_v40 = vpop.trf.xlu0 }
  0x97   : > { %v542_v48 = vpop.trf.xlu1 }
  0x9b   : > { %696 = vmatmul.mubr.bf16.gmra.mrb[16].mxu0 %v523_v37 }
  0x9c   : > { %705 = vmatprep.mubr.bf16.mxu0 %v1875_v0 }
  0xa3   : > { %706 = vmatmul.mubr.bf16.gmra.mrb[20].mxu0 %v524_v38 }
  0xa4   : > { %715 = vmatprep.mubr.bf16.mxu0 %v1875_v0 }
  0xab   : > { %716 = vmatmul.mubr.bf16.gmra.mrb[24].mxu0 %v525_v39 }
  0xac   : > { %725 = vmatprep.mubr.bf16.mxu0 %v1875_v0 }
  0xb3   : > { %726 = vmatmul.mubr.bf16.gmra.mrb[28].mxu0 %v526_v40 }
  0xb4   : > { %735 = vmatprep.mubr.bf16.mxu0 %v1875_v0 }
  0xbb   : > { %736 = vmatmul.mubr.bf16.gmra.mrb[32].mxu0 %v535_v41 }
  0xbc   : > { %745 = vmatprep.mubr.bf16.mxu0 %v1875_v0 }
  0xc3   : > { %746 = vmatmul.mubr.bf16.gmra.mrb[36].mxu0 %v536_v42 }
  0xc4   : > { %755 = vmatprep.mubr.bf16.mxu0 %v1875_v0 }
  0xcb   : > { %756 = vmatmul.mubr.bf16.gmra.mrb[40].mxu0 %v537_v43 }
  0xcc   : > { %765 = vmatprep.mubr.bf16.mxu0 %v1875_v0 }
  0xd3   : > { %766 = vmatmul.mubr.bf16.gmra.mrb[44].mxu0 %v538_v44 }
  0xd4   : > { %775 = vmatprep.mubr.bf16.mxu0 %v1875_v0 }
  0xdb   : > { %776 = vmatmul.mubr.bf16.gmra.mrb[48].mxu0 %v539_v45 }
  0xdc   : > { %785 = vmatprep.mubr.bf16.mxu0 %v1875_v0 }
  0xe3   : > { %786 = vmatmul.mubr.bf16.gmra.mrb[52].mxu0 %v540_v46 }
  0xe4   : > { %795 = vmatprep.mubr.bf16.mxu0 %v1875_v0 }
  0xeb   : > { %796 = vmatmul.mubr.bf16.gmra.mrb[56].mxu0 %v541_v47 }
  0xec   : > { %805 = vmatprep.mubr.bf16.mxu0 %v1875_v0 }
  0xf3   : > { %806 = vmatmul.mubr.bf16.gmra.mrb[60].mxu0 %v542_v48 }
 0x14e   : > { %v1991_v49 = vpop.f32.mrb[0].mxu0 }
 0x14f   : > { %v1993_v50 = vpop.f32.mrb[1].mxu0 }
 0x150   : > { %v1995_v51 = vpop.f32.mrb[2].mxu0 }
 0x151   : > { %v1997_v52 = vpop.f32.mrb[3].mxu0 }
 0x156   : > { %v1999_v54 = vpop.f32.mrb[4].mxu0 }
 0x157   : > { %v817_v55 = vmax.f32 %v1991_v49, %v1999_v54  ;;  %v2003_v56 = vpop.f32.mrb[5].mxu0 }
 0x158   : > { %v854_v58 = vmax.f32 %v1993_v50, %v2003_v56  ;;  %v2012_v59 = vpop.f32.mrb[6].mxu0 }
 0x159   : > { %v818_v62 = vmax.f32 %v1995_v51, %v2012_v59  ;;  %v2020_v63 = vpop.f32.mrb[7].mxu0 }
 0x15a   : > { %v855_v0 = vmax.f32 %v1997_v52, %v2020_v63 }
 0x15e   : > { %v2024_v1 = vpop.f32.mrb[8].mxu0 }
 0x15f   : > { %v819_v2 = vmax.f32 %v817_v55, %v2024_v1  ;;  %v2027_v3 = vpop.f32.mrb[9].mxu0 }
 0x160   : > { %v856_v4 = vmax.f32 %v854_v58, %v2027_v3  ;;  %v2030_v5 = vpop.f32.mrb[10].mxu0 }
 0x161   : > { %v820_v6 = vmax.f32 %v818_v62, %v2030_v5  ;;  %v2033_v7 = vpop.f32.mrb[11].mxu0 }
 0x162   : > { %v857_v8 = vmax.f32 %v855_v0, %v2033_v7 }
 0x166   : > { %v2036_v9 = vpop.f32.mrb[12].mxu0 }
 0x167   : > { %v821_v10 = vmax.f32 %v819_v2, %v2036_v9  ;;  %v2039_v11 = vpop.f32.mrb[13].mxu0 }
 0x168   : > { %v858_v12 = vmax.f32 %v856_v4, %v2039_v11  ;;  %v2042_v13 = vpop.f32.mrb[14].mxu0 }
 0x169   : > { %v822_v14 = vmax.f32 %v820_v6, %v2042_v13  ;;  %v2045_v15 = vpop.f32.mrb[15].mxu0 }
 0x16a   : > { %v859_v16 = vmax.f32 %v857_v8, %v2045_v15 }
 0x16e   : > { %v2048_v17 = vpop.f32.mrb[16].mxu0 }
 0x16f   : > { %v823_v18 = vmax.f32 %v821_v10, %v2048_v17  ;;  %v2051_v19 = vpop.f32.mrb[17].mxu0 }
 0x170   : > { %v860_v20 = vmax.f32 %v858_v12, %v2051_v19  ;;  %v2054_v21 = vpop.f32.mrb[18].mxu0 }
 0x171   : > { %v824_v22 = vmax.f32 %v822_v14, %v2054_v21  ;;  %v2057_v23 = vpop.f32.mrb[19].mxu0 }
 0x172   : > { %v861_v24 = vmax.f32 %v859_v16, %v2057_v23 }
 0x176   : > { %v2060_v25 = vpop.f32.mrb[20].mxu0 }
 0x177   : > { %v825_v26 = vmax.f32 %v823_v18, %v2060_v25  ;;  %v2063_v27 = vpop.f32.mrb[21].mxu0 }
 0x178   : > { %v862_v28 = vmax.f32 %v860_v20, %v2063_v27  ;;  %v2066_v29 = vpop.f32.mrb[22].mxu0 }
 0x179   : > { %v826_v30 = vmax.f32 %v824_v22, %v2066_v29  ;;  %v2069_v31 = vpop.f32.mrb[23].mxu0 }
 0x17a   : > { %v863_v32 = vmax.f32 %v861_v24, %v2069_v31 }
 0x17e   : > { %v2072_v33 = vpop.f32.mrb[24].mxu0 }
 0x17f   : > { %v827_v34 = vmax.f32 %v825_v26, %v2072_v33  ;;  %v2075_v35 = vpop.f32.mrb[25].mxu0 }
 0x180   : > { %v864_v36 = vmax.f32 %v862_v28, %v2075_v35  ;;  %v2078_v37 = vpop.f32.mrb[26].mxu0 }
 0x181   : > { %v828_v38 = vmax.f32 %v826_v30, %v2078_v37  ;;  %v2081_v39 = vpop.f32.mrb[27].mxu0 }
 0x182   : > { %v865_v40 = vmax.f32 %v863_v32, %v2081_v39 }
 0x186   : > { %v2084_v41 = vpop.f32.mrb[28].mxu0 }
 0x187   : > { %v829_v42 = vmax.f32 %v827_v34, %v2084_v41  ;;  %v2087_v43 = vpop.f32.mrb[29].mxu0 }
 0x188   : > { %v866_v44 = vmax.f32 %v864_v36, %v2087_v43  ;;  %v2090_v45 = vpop.f32.mrb[30].mxu0 }
 0x189   : > { %v830_v46 = vmax.f32 %v828_v38, %v2090_v45  ;;  %v2093_v47 = vpop.f32.mrb[31].mxu0 }
 0x18a   : > { %v867_v48 = vmax.f32 %v865_v40, %v2093_v47 }
 0x18e   : > { %v2096_v55 = vpop.f32.mrb[32].mxu0 }
 0x18f   : > { %v831_v58 = vmax.f32 %v829_v42, %v2096_v55  ;;  %v2099_v60 = vpop.f32.mrb[33].mxu0 }
 0x190   : > { %v868_v61 = vmax.f32 %v866_v44, %v2099_v60  ;;  %v2102_v62 = vpop.f32.mrb[34].mxu0 }
 0x191   : > { %v832_v0 = vmax.f32 %v830_v46, %v2102_v62  ;;  %v2105_v2 = vpop.f32.mrb[35].mxu0 }
 0x192   : > { %v869_v4 = vmax.f32 %v867_v48, %v2105_v2 }
 0x196   : > { %v2108_v6 = vpop.f32.mrb[36].mxu0 }
 0x197   : > { %v833_v8 = vmax.f32 %v831_v58, %v2108_v6  ;;  %v2111_v10 = vpop.f32.mrb[37].mxu0 }
 0x198   : > { %v870_v12 = vmax.f32 %v868_v61, %v2111_v10  ;;  %v2114_v14 = vpop.f32.mrb[38].mxu0 }
 0x199   : > { %v834_v16 = vmax.f32 %v832_v0, %v2114_v14  ;;  %v2117_v18 = vpop.f32.mrb[39].mxu0 }
 0x19a   : > { %2699 = vst [vmem:[#allocation7_spill] sm:$0xff] %v2117_v18  ;;  %v871_v20 = vmax.f32 %v869_v4, %v2117_v18 }
 0x19e   : > { %v2120_v22 = vpop.f32.mrb[40].mxu0 }
 0x19f   : > { %2700 = vst [vmem:[#allocation8_spill] sm:$0xff] %v2120_v22  ;;  %v835_v24 = vmax.f32 %v833_v8, %v2120_v22  ;;  %v2123_v26 = vpop.f32.mrb[41].mxu0 }
 0x1a0   : > { %2701 = vst [vmem:[#allocation9_spill] sm:$0xff] %v2123_v26  ;;  %v872_v28 = vmax.f32 %v870_v12, %v2123_v26  ;;  %v2126_v30 = vpop.f32.mrb[42].mxu0  ;;  %v2723_v26 = vlaneseq }
 0x1a1   : > { %2702 = vst [vmem:[#allocation10_spill] sm:$0xff] %v2126_v30  ;;  %v836_v32 = vmax.f32 %v834_v16, %v2126_v30  ;;  %v2129_v34 = vpop.f32.mrb[43].mxu0 }
 0x1a2   : > { %2703 = vst [vmem:[#allocation11_spill] sm:$0xff] %v2129_v34  ;;  %v873_v36 = vmax.f32 %v871_v20, %v2129_v34 }
 0x1a6   : > { %v2132_v38 = vpop.f32.mrb[44].mxu0 }
 0x1a7   : > { %2704 = vst [vmem:[#allocation12_spill] sm:$0xff] %v2132_v38  ;;  %v837_v40 = vmax.f32 %v835_v24, %v2132_v38  ;;  %v2135_v42 = vpop.f32.mrb[45].mxu0 }
 0x1a8   : > { %2705 = vst [vmem:[#allocation13_spill] sm:$0xff] %v2135_v42  ;;  %v874_v44 = vmax.f32 %v872_v28, %v2135_v42  ;;  %v2138_v46 = vpop.f32.mrb[46].mxu0 }
 0x1a9   : > { %2706 = vst [vmem:[#allocation14_spill] sm:$0xff] %v2138_v46  ;;  %v838_v48 = vmax.f32 %v836_v32, %v2138_v46  ;;  %v2141_v58 = vpop.f32.mrb[47].mxu0 }
 0x1aa   : > { %2707 = vst [vmem:[#allocation15_spill] sm:$0xff] %v2141_v58  ;;  %v875_v61 = vmax.f32 %v873_v36, %v2141_v58 }
 0x1ae   : > { %v2144_v0 = vpop.f32.mrb[48].mxu0 }
 0x1af   : > { %2708 = vst [vmem:[#allocation16_spill] sm:$0xff] %v2144_v0  ;;  %v839_v4 = vmax.f32 %v837_v40, %v2144_v0  ;;  %v2147_v8 = vpop.f32.mrb[49].mxu0 }
 0x1b0   : > { %2709 = vst [vmem:[#allocation17_spill] sm:$0xff] %v2147_v8  ;;  %v876_v12 = vmax.f32 %v874_v44, %v2147_v8  ;;  %v2150_v16 = vpop.f32.mrb[50].mxu0 }
 0x1b1   : > { %2710 = vst [vmem:[#allocation18_spill] sm:$0xff] %v2150_v16  ;;  %v840_v20 = vmax.f32 %v838_v48, %v2150_v16  ;;  %v2153_v24 = vpop.f32.mrb[51].mxu0 }
 0x1b2   : > { %2711 = vst [vmem:[#allocation19_spill] sm:$0xff] %v2153_v24  ;;  %v877_v28 = vmax.f32 %v875_v61, %v2153_v24 }
 0x1b6   : > { %v2156_v32 = vpop.f32.mrb[52].mxu0 }
 0x1b7   : > { %2712 = vst [vmem:[#allocation20_spill] sm:$0xff] %v2156_v32  ;;  %v841_v36 = vmax.f32 %v839_v4, %v2156_v32  ;;  %v2159_v53 = vpop.f32.mrb[53].mxu0 }
 0x1b8   : > { %2713 = vst [vmem:[#allocation21_spill] sm:$0xff] %v2159_v53  ;;  %v878_v40 = vmax.f32 %v876_v12, %v2159_v53  ;;  %v2162_v0 = vpop.f32.mrb[54].mxu0 }
 0x1b9   : > { %2714 = vst [vmem:[#allocation22_spill] sm:$0xff] %v2162_v0  ;;  %v842_v44 = vmax.f32 %v840_v20, %v2162_v0  ;;  %v2165_v8 = vpop.f32.mrb[55].mxu0 }
 0x1ba   : > { %2715 = vst [vmem:[#allocation23_spill] sm:$0xff] %v2165_v8  ;;  %v879_v48 = vmax.f32 %v877_v28, %v2165_v8 }
 0x1be   : > { %v2168_v16 = vpop.f32.mrb[56].mxu0 }
 0x1bf   : > { %2716 = vst [vmem:[#allocation24_spill] sm:$0xff] %v2168_v16  ;;  %v843_v61 = vmax.f32 %v841_v36, %v2168_v16  ;;  %v2171_v24 = vpop.f32.mrb[57].mxu0 }
 0x1c0   : > { %2717 = vst [vmem:[#allocation25_spill] sm:$0xff] %v2171_v24  ;;  %v880_v4 = vmax.f32 %v878_v40, %v2171_v24  ;;  %v2174_v32 = vpop.f32.mrb[58].mxu0 }
 0x1c1   : > { %2718 = vst [vmem:[#allocation26_spill] sm:$0xff] %v2174_v32  ;;  %v844_v12 = vmax.f32 %v842_v44, %v2174_v32  ;;  %v2177_v53 = vpop.f32.mrb[59].mxu0 }
 0x1c2   : > { %2719 = vst [vmem:[#allocation27_spill] sm:$0xff] %v2177_v53  ;;  %v881_v20 = vmax.f32 %v879_v48, %v2177_v53 }
 0x1c6   : > { %v2180_v0 = vpop.f32.mrb[60].mxu0 }
 0x1c7   : > { %2720 = vst [vmem:[#allocation28_spill] sm:$0xff] %v2180_v0  ;;  %v845_v28 = vmax.f32 %v843_v61, %v2180_v0  ;;  %v2183_v8 = vpop.f32.mrb[61].mxu0  ;;  %v1878_v61 = vmov 1966171168  }
 0x1c8   : > { %2721 = vst [vmem:[#allocation29_spill] sm:$0xff] %v2183_v8  ;;  %v882_v36 = vmax.f32 %v880_v4, %v2183_v8  ;;  %v2186_v16 = vpop.f32.mrb[62].mxu0  ;;  %v895_v0 = vunpack.c.l.s4 %v1878_v61 }
 0x1c9   : > { %2722 = vst [vmem:[#allocation30_spill] sm:$0xff] %v2186_v16  ;;  %v846_v40 = vmax.f32 %v844_v12, %v2186_v16  ;;  %v2189_v24 = vpop.f32.mrb[63].mxu0  ;;  %v898_v12 = vshrl.u32 %v2723_v26, 7 }
 0x1ca   : > { %v883_v44 = vmax.f32 %v881_v20, %v2189_v24  ;;  %v896_v30 = vunpack.c.0.s8 %v895_v0 }
 0x1cb   : > { %v847_v32 = vmax.f32 %v845_v28, %v846_v40  ;;  %v2205_v26 = vsub.s32 0, %v898_v12 }
 0x1cc   : > { %v884_v58 = vmax.f32 %v882_v36, %v883_v44  ;;  %v2193_v28 = vsub.s32 %v896_v30, %v898_v12  ;;  %v2733_v30 = vld [vmem:[#allocation11_spill] sm:$0xff] }
 0x1cd   : > { %v848_v46 = vrot.slane %v847_v32, 4  ;;  %2726 = vst [vmem:[#allocation33_spill] sm:$0xff] %v2205_v26 }
 0x1ce   : > { %v885_v48 = vrot.slane %v884_v58, 4  ;;  %2724 = vst [vmem:[#allocation31_spill] sm:$0xff] %v2193_v28 }
 0x1cf   : > { %v849_v53 = vmax.f32 %v847_v32, %v848_v46 }
 0x1d0   : > { %v886_v42 = vmax.f32 %v884_v58, %v885_v48  ;;  %v2197_v58 = vld [vmem:[#allocation2] sm:$0x3]  ;;  %v2752_v48 = vld [vmem:[#allocation30_spill] sm:$0xff] }
 0x1d1   : > { %v850_v38 = vrot.slane %v849_v53, 2  ;;  %2725 = vst [vmem:[#allocation32_spill] sm:$0xff] %v2197_v58 }
 0x1d2   : > { %v887_v34 = vrot.slane %v886_v42, 2 }
 0x1d3   : > { %v851_v4 = vmax.f32 %v849_v53, %v850_v38 }
 0x1d4   : > { %v888_v8 = vmax.f32 %v886_v42, %v887_v34  ;;  %v2207_v34 = vsub.s32 1, %v898_v12  ;;  %v2734_v12 = vld [vmem:[#allocation12_spill] sm:$0xff] }
 0x1d5   : > { %v852_v16 = vrot.slane %v851_v4, 1 }
 0x1d6   : > { %v889_v22 = vrot.slane %v888_v8, 1  ;;  %2727 = vst [vmem:[#allocation34_spill] sm:$0xff] %v2207_v34 }
 0x1d7   : > { %v853_v18 = vmax.f32 %v851_v4, %v852_v16  ;;  %v2736_v4 = vld [vmem:[#allocation14_spill] sm:$0xff] }
 0x1d8   : > { %v890_v20 = vmax.f32 %v888_v8, %v889_v22  ;;  %v1715_v22 = vld [vmem:[%s2202_s8 + $0x4] ss:$8 sps:$4 sm:$0xff]  }
 0x1d9   : > { %1331 = vmatprep.mubr.bf16.mxu1 %v1715_v22  ;;  %v2732_v22 = vld [vmem:[#allocation10_spill] sm:$0xff] }
 0x1da   : > { %v893_v36 = vcombine.low %v853_v18, %v890_v20  ;;  %v2735_v20 = vld [vmem:[#allocation13_spill] sm:$0xff] }
 0x1dc   : > { %v900_v46 = vrot.slane %v893_v36, %v2193_v28  ;;  %v2729_v36 = vld [vmem:[#allocation7_spill] sm:$0xff] }
 0x1de   : > { %v907_v53 = vrot.slane %v900_v46, %v2193_v28  ;;  %v2730_v46 = vld [vmem:[#allocation8_spill] sm:$0xff]  ;;  %v2748_v28 = vld [vmem:[#allocation26_spill] sm:$0xff] }
 0x1e0   : > { %v2211_v18 = vmax.f32 %v2197_v58, %v907_v53  ;;  %v2731_v53 = vld [vmem:[#allocation9_spill] sm:$0xff] }
 0x1e2   : > { %2728 = vst [vmem:[#allocation35_spill] sm:$0xff] %v2211_v18  ;;  %v2217_v38 = vrot.slane %v2211_v18, %v2205_v26  ;;  %v2221_v42 = vrot.slane %v2211_v18, %v2207_v34  ;;  %1368 = vst.msk [vmem:[#allocation2] sm:$0x3] %vm2006_vm0, %v2211_v18  ;;  %v2746_v26 = vld [vmem:[#allocation24_spill] sm:$0xff]  ;;  %v2749_v18 = vld [vmem:[#allocation27_spill] sm:$0xff] }
 0x1e4   : > { %v2753_v40 = vsub.f32 %v1991_v49, %v2217_v38  ;;  %v2754_v32 = vsub.f32 %v1993_v50, %v2221_v42  ;;  %v2755_v8 = vsub.f32 %v1995_v51, %v2217_v38  ;;  %v2756_v0 = vsub.f32 %v1997_v52, %v2221_v42 }
 0x1e5   : > { %v2757_v44 = vsub.f32 %v1999_v54, %v2217_v38  ;;  %v2758_v49 = vsub.f32 %v2003_v56, %v2221_v42  ;;  %v2759_v50 = vsub.f32 %v2012_v59, %v2217_v38  ;;  %v2760_v52 = vsub.f32 %v2020_v63, %v2221_v42 }
 0x1e6   : > { %v988_v57 = vmul.f32 1.442695, %v2753_v40  ;;  %v990_v16 = vmul.f32 1.442695, %v2754_v32  ;;  %v992_v58 = vmul.f32 1.442695, %v2755_v8  ;;  %v2761_v54 = vsub.f32 %v2024_v1, %v2217_v38 }
 0x1e7   : > { %v994_v61 = vmul.f32 1.442695, %v2756_v0  ;;  %v996_v34 = vmul.f32 1.442695, %v2757_v44  ;;  %v998_v40 = vmul.f32 1.442695, %v2758_v49  ;;  %v2762_v56 = vsub.f32 %v2027_v3, %v2221_v42 }
 0x1e8   : > { %1719 = vpow2.f32 %v988_v57  ;;  %v1000_v51 = vmul.f32 1.442695, %v2759_v50  ;;  %v1002_v0 = vmul.f32 1.442695, %v2760_v52  ;;  %v1004_v57 = vmul.f32 1.442695, %v2761_v54 }
 0x1e9   : > { %1721 = vpow2.f32 %v990_v16  ;;  %v1006_v8 = vmul.f32 1.442695, %v2762_v56  ;;  %v2763_v59 = vsub.f32 %v2030_v5, %v2217_v38  ;;  %v2764_v63 = vsub.f32 %v2033_v7, %v2221_v42 }
 0x1ea   : > { %1723 = vpow2.f32 %v992_v58  ;;  %v2765_v1 = vsub.f32 %v2036_v9, %v2217_v38  ;;  %v2766_v3 = vsub.f32 %v2039_v11, %v2221_v42  ;;  %v2767_v5 = vsub.f32 %v2042_v13, %v2217_v38 }
 0x1eb   : > { %1725 = vpow2.f32 %v994_v61  ;;  %v1008_v58 = vmul.f32 1.442695, %v2763_v59  ;;  %v1010_v16 = vmul.f32 1.442695, %v2764_v63  ;;  %v2768_v7 = vsub.f32 %v2045_v15, %v2221_v42 }
 0x1ec   : > { %1727 = vpow2.f32 %v996_v34  ;;  %v1012_v34 = vmul.f32 1.442695, %v2765_v1  ;;  %v1014_v32 = vmul.f32 1.442695, %v2766_v3  ;;  %v1016_v61 = vmul.f32 1.442695, %v2767_v5 }
 0x1ed   : > { %1729 = vpow2.f32 %v998_v40  ;;  %v1018_v40 = vmul.f32 1.442695, %v2768_v7  ;;  %v2769_v9 = vsub.f32 %v2048_v17, %v2217_v38  ;;  %v2770_v52 = vsub.f32 %v2051_v19, %v2221_v42 }
 0x1ee   : > { %1731 = vpow2.f32 %v1000_v51  ;;  %v2771_v54 = vsub.f32 %v2054_v21, %v2217_v38  ;;  %v2772_v56 = vsub.f32 %v2057_v23, %v2221_v42  ;;  %v2773_v59 = vsub.f32 %v2060_v25, %v2217_v38 }
 0x1ef   : > { %1733 = vpow2.f32 %v1002_v0  ;;  %v1020_v51 = vmul.f32 1.442695, %v2769_v9  ;;  %v1022_v0 = vmul.f32 1.442695, %v2770_v52  ;;  %v2774_v63 = vsub.f32 %v2063_v27, %v2221_v42 }
 0x1f0   : > { %1735 = vpow2.f32 %v1004_v57  ;;  %v1024_v57 = vmul.f32 1.442695, %v2771_v54  ;;  %v2775_v1 = vsub.f32 %v2066_v29, %v2217_v38  ;;  %v2777_v25 = vsub.f32 %v2072_v33, %v2217_v38 }
 0x1f1   : > { %1737 = vpow2.f32 %v1006_v8  ;;  %v1026_v8 = vmul.f32 1.442695, %v2772_v56  ;;  %v2778_v27 = vsub.f32 %v2075_v35, %v2221_v42  ;;  %v2779_v7 = vsub.f32 %v2078_v37, %v2217_v38 }
 0x1f2   : > { %v1720_v44 = vpop.eup %1719  ;;  %1739 = vpow2.f32 %v1008_v58  ;;  %v1028_v58 = vmul.f32 1.442695, %v2773_v59  ;;  %v1032_v23 = vmul.f32 1.442695, %v2775_v1 }
 0x1f3   : > { %v1722_v49 = vpop.eup %1721  ;;  %1741 = vpow2.f32 %v1010_v16  ;;  %v1030_v16 = vmul.f32 1.442695, %v2774_v63 }
 0x1f4   : > { %v1724_v50 = vpop.eup %1723  ;;  %1743 = vpow2.f32 %v1012_v34  ;;  %v2776_v34 = vsub.f32 %v2069_v31, %v2221_v42 }
 0x1f5   : > { %v1726_v11 = vpop.eup %1725  ;;  %1745 = vpow2.f32 %v1014_v32  ;;  %v1036_v32 = vmul.f32 1.442695, %v2777_v25  ;;  %v1118_v29 = vadd.f32 %v1724_v50, %v1720_v44  ;;  %v1247_v52 = vpack.c.bf16 %v1724_v50, %v1720_v44 }
 0x1f6   : > { %v1728_v13 = vpop.eup %1727  ;;  %1747 = vpow2.f32 %v1016_v61  ;;  %v1034_v3 = vmul.f32 1.442695, %v2776_v34  ;;  %v1038_v61 = vmul.f32 1.442695, %v2778_v27  ;;  %v1248_v31 = vpack.c.bf16 %v1726_v11, %v1722_v49 }
 0x1f7   : > { %v1730_v15 = vpop.eup %1729  ;;  %1749 = vpow2.f32 %v1018_v40  ;;  %v1040_v40 = vmul.f32 1.442695, %v2779_v7  ;;  %v1119_v33 = vadd.f32 %v1728_v13, %v1118_v29  ;;  %v2783_v34 = vsub.f32 %v2090_v45, %v2217_v38 }
 0x1f8   : > { %v1732_v17 = vpop.eup %1731  ;;  %1751 = vpow2.f32 %v1020_v51  ;;  %v1155_v51 = vadd.f32 %v1726_v11, %v1722_v49  ;;  %1299 = vmatprep.subr.bf16.mxu1 %v1248_v31  ;;  %v2781_v11 = vsub.f32 %v2084_v41, %v2217_v38  ;;  %v2787_v31 = vsub.f32 %v2102_v62, %v2217_v38 }
 0x1f9   : > { %v1734_v19 = vpop.eup %1733  ;;  %1753 = vpow2.f32 %v1022_v0  ;;  %v1120_v44 = vadd.f32 %v1732_v17, %v1119_v33  ;;  %1300 = vmatpush1.bf16.msra.mxu1 %v1247_v52  ;;  %v1048_v41 = vmul.f32 1.442695, %v2783_v34 }
 0x1fa   : > { %v2420_v21 = vpop.eup %1735  ;;  %1755 = vpow2.f32 %v1024_v57  ;;  %v1250_v54 = vpack.c.bf16 %v1734_v19, %v1730_v15  ;;  %v1249_v57 = vpack.c.bf16 %v1732_v17, %v1728_v13  ;;  %v1156_v35 = vadd.f32 %v1730_v15, %v1155_v51 }
 0x1fb   : > { %v1738_v5 = vpop.eup %1737  ;;  %1757 = vpow2.f32 %v1026_v8  ;;  %v1044_v13 = vmul.f32 1.442695, %v2781_v11 }
 0x1fc   : > { %v1740_v9 = vpop.eup %1739  ;;  %1759 = vpow2.f32 %v1028_v58  ;;  %v2780_v58 = vsub.f32 %v2081_v39, %v2221_v42  ;;  %v1157_v63 = vadd.f32 %v1734_v19, %v1156_v35  ;;  %1301 = vmatprep.subr.bf16.mxu1 %v1250_v54  ;;  %v2788_v54 = vsub.f32 %v2105_v2, %v2221_v42 }
 0x1fd   : > { %v1742_v0 = vpop.eup %1741  ;;  %1761 = vpow2.f32 %v1030_v16  ;;  %v1251_v37 = vpack.c.bf16 %v1740_v9, %v2420_v21  ;;  %v2782_v16 = vsub.f32 %v2087_v43, %v2221_v42  ;;  %1302 = vmatpush1.bf16.msra.mxu1 %v1249_v57  ;;  %v2789_v35 = vsub.f32 %v2108_v6, %v2217_v38 }
 0x1fe   : > { %v2437_v56 = vpop.eup %1743  ;;  %1763 = vpow2.f32 %v1032_v23  ;;  %v1252_v8 = vpack.c.bf16 %v1742_v0, %v1738_v5  ;;  %v1042_v49 = vmul.f32 1.442695, %v2780_v58  ;;  %v1121_v23 = vadd.f32 %v2420_v21, %v1120_v44 }
 0x1ff   : > { %v1746_v59 = vpop.eup %1745  ;;  %1765 = vpow2.f32 %v1034_v3  ;;  %v1046_v1 = vmul.f32 1.442695, %v2782_v16  ;;  %v1158_v3 = vadd.f32 %v1738_v5, %v1157_v63  ;;  %v2786_v5 = vsub.f32 %v2099_v60, %v2221_v42 }
 0x200   : > { %v1748_v50 = vpop.eup %1747  ;;  %1767 = vpow2.f32 %v1036_v32  ;;  %v2784_v32 = vsub.f32 %v2093_v47, %v2221_v42  ;;  %v1122_v27 = vadd.f32 %v1740_v9, %v1121_v23  ;;  %1303 = vmatprep.subr.bf16.mxu1 %v1252_v8  ;;  %v1058_v60 = vmul.f32 1.442695, %v2788_v54 }
 0x201   : > { %v1750_v15 = vpop.eup %1749  ;;  %1769 = vpow2.f32 %v1038_v61  ;;  %v1253_v39 = vpack.c.bf16 %v1748_v50, %v2437_v56  ;;  %v2785_v61 = vsub.f32 %v2096_v55, %v2217_v38  ;;  %v1054_v29 = vmul.f32 1.442695, %v2786_v5  ;;  %1304 = vmatpush1.bf16.msra.mxu1 %v1251_v37 }
 0x202   : > { %v2451_v17 = vpop.eup %1751  ;;  %1771 = vpow2.f32 %v1040_v40  ;;  %v1254_v19 = vpack.c.bf16 %v1750_v15, %v1746_v59  ;;  %v1050_v43 = vmul.f32 1.442695, %v2784_v32  ;;  %v1159_v40 = vadd.f32 %v1742_v0, %v1158_v3 }
 0x203   : > { %v1754_v25 = vpop.eup %1753  ;;  %1773 = vpow2.f32 %v1042_v49  ;;  %v1052_v7 = vmul.f32 1.442695, %v2785_v61  ;;  %v1123_v51 = vadd.f32 %v2437_v56, %v1122_v27  ;;  %v1056_v55 = vmul.f32 1.442695, %v2787_v31 }
 0x204   : > { %v1756_v21 = vpop.eup %1755  ;;  %1775 = vpow2.f32 %v1044_v13  ;;  %v1160_v52 = vadd.f32 %v1746_v59, %v1159_v40  ;;  %v1060_v8 = vmul.f32 1.442695, %v2789_v35  ;;  %1305 = vmatprep.subr.bf16.mxu1 %v1254_v19  ;;  %v2790_v59 = vsub.f32 %v2111_v10, %v2221_v42 }
 0x205   : > { %v1758_v45 = vpop.eup %1757  ;;  %1777 = vpow2.f32 %v1046_v1  ;;  %v1255_v47 = vpack.c.bf16 %v1756_v21, %v2451_v17  ;;  %v1124_v57 = vadd.f32 %v1748_v50, %v1123_v51  ;;  %v2791_v37 = vsub.f32 %v2114_v14, %v2217_v38  ;;  %1306 = vmatpush1.bf16.msra.mxu1 %v1253_v39 }
 0x206   : > { %v2467_v9 = vpop.eup %1759  ;;  %1779 = vpow2.f32 %v1048_v41  ;;  %v1256_v0 = vpack.c.bf16 %v1758_v45, %v1754_v25  ;;  %v1161_v58 = vadd.f32 %v1750_v15, %v1160_v52  ;;  %v1062_v49 = vmul.f32 1.442695, %v2790_v59 }
 0x207   : > { %v1762_v33 = vpop.eup %1761  ;;  %1781 = vpow2.f32 %v1050_v43  ;;  %v1125_v44 = vadd.f32 %v2451_v17, %v1124_v57  ;;  %v1064_v6 = vmul.f32 1.442695, %v2791_v37  ;;  %v2792_v15 = vsub.f32 %v2729_v36, %v2221_v42 }
 0x208   : > { %v1764_v56 = vpop.eup %1763  ;;  %1783 = vpow2.f32 %v1052_v7  ;;  %v1162_v11 = vadd.f32 %v1754_v25, %v1161_v58  ;;  %v2793_v23 = vsub.f32 %v2730_v46, %v2217_v38  ;;  %1307 = vmatprep.subr.bf16.mxu1 %v1256_v0  ;;  %v2794_v41 = vsub.f32 %v2731_v53, %v2221_v42 }
 0x209   : > { %v1766_v62 = vpop.eup %1765  ;;  %1785 = vpow2.f32 %v1054_v29  ;;  %v1257_v2 = vpack.c.bf16 %v1764_v56, %v2467_v9  ;;  %v1066_v10 = vmul.f32 1.442695, %v2792_v15  ;;  %v1126_v16 = vadd.f32 %v1756_v21, %v1125_v44  ;;  %1308 = vmatpush1.bf16.msra.mxu1 %v1255_v47 }
 0x20a   : > { %v2483_v50 = vpop.eup %1767  ;;  %1787 = vpow2.f32 %v1056_v55  ;;  %v1258_v13 = vpack.c.bf16 %v1766_v62, %v1762_v33  ;;  %v1068_v17 = vmul.f32 1.442695, %v2793_v23  ;;  %v1163_v34 = vadd.f32 %v1758_v45, %v1162_v11 }
 0x20b   : > { %v1770_v63 = vpop.eup %1769  ;;  %1789 = vpow2.f32 %v1058_v60  ;;  %v1070_v3 = vmul.f32 1.442695, %v2794_v41  ;;  %v1127_v19 = vadd.f32 %v2467_v9, %v1126_v16  ;;  %v2795_v39 = vsub.f32 %v2732_v22, %v2217_v38 }
 0x20c   : > { %v1772_v1 = vpop.eup %1771  ;;  %1791 = vpow2.f32 %v1060_v8  ;;  %v1164_v32 = vadd.f32 %v1762_v33, %v1163_v34  ;;  %v2796_v21 = vsub.f32 %v2733_v30, %v2221_v42  ;;  %v2797_v40 = vsub.f32 %v2734_v12, %v2217_v38  ;;  %1309 = vmatprep.subr.bf16.mxu1 %v1258_v13  ;;  %v2800_v33 = vld [vmem:[#allocation15_spill] sm:$0xff]  ;;  %v2810_v34 = vld [vmem:[#allocation20_spill] sm:$0xff] }
 0x20d   : > { %v1774_v14 = vpop.eup %1773  ;;  %1793 = vpow2.f32 %v1062_v49  ;;  %v1259_v36 = vpack.c.bf16 %v1772_v1, %v2483_v50  ;;  %v1072_v46 = vmul.f32 1.442695, %v2795_v39  ;;  %v1128_v61 = vadd.f32 %v1764_v56, %v1127_v19  ;;  %1310 = vmatpush1.bf16.msra.mxu1 %v1257_v2  ;;  %v2802_v56 = vld [vmem:[#allocation16_spill] sm:$0xff]  ;;  %v2806_v2 = vld [vmem:[#allocation18_spill] sm:$0xff] }
 0x20e   : > { %v2499_v25 = vpop.eup %1775  ;;  %1795 = vpow2.f32 %v1064_v6  ;;  %v1260_v43 = vpack.c.bf16 %v1774_v14, %v1770_v63  ;;  %v1074_v53 = vmul.f32 1.442695, %v2796_v21  ;;  %v1076_v45 = vmul.f32 1.442695, %v2797_v40 }
 0x20f   : > { %v1778_v27 = vpop.eup %1777  ;;  %1797 = vpow2.f32 %v1066_v10  ;;  %v1165_v5 = vadd.f32 %v1766_v62, %v1164_v32  ;;  %v2798_v29 = vsub.f32 %v2735_v20, %v2221_v42  ;;  %v1129_v9 = vadd.f32 %v2483_v50, %v1128_v61  ;;  %v2804_v62 = vld [vmem:[#allocation17_spill] sm:$0xff]  ;;  %v2808_v10 = vld [vmem:[#allocation19_spill] sm:$0xff] }
 0x210   : > { %v1780_v7 = vpop.eup %1779  ;;  %1799 = vpow2.f32 %v1068_v17  ;;  %v2799_v47 = vsub.f32 %v2736_v4, %v2217_v38  ;;  %v2801_v54 = vsub.f32 %v2800_v33, %v2221_v42  ;;  %v2803_v35 = vsub.f32 %v2802_v56, %v2217_v38  ;;  %1311 = vmatprep.subr.bf16.mxu1 %v1260_v43 }
 0x211   : > { %v1782_v22 = vpop.eup %1781  ;;  %1801 = vpow2.f32 %v1070_v3  ;;  %v1078_v51 = vmul.f32 1.442695, %v2798_v29  ;;  %v1261_v30 = vpack.c.bf16 %v1780_v7, %v2499_v25  ;;  %v1166_v55 = vadd.f32 %v1770_v63, %v1165_v5  ;;  %1312 = vmatpush1.bf16.msra.mxu1 %v1259_v36  ;;  %v2814_v36 = vld [vmem:[#allocation22_spill] sm:$0xff] }
 0x212   : > { %v2515_v31 = vpop.eup %1783  ;;  %1803 = vpow2.f32 %v1072_v46  ;;  %v1080_v12 = vmul.f32 1.442695, %v2799_v47  ;;  %v1262_v52 = vpack.c.bf16 %v1782_v22, %v1778_v27  ;;  %v1082_v20 = vmul.f32 1.442695, %v2801_v54 }
 0x213   : > { %v1786_v0 = vpop.eup %1785  ;;  %1805 = vpow2.f32 %v1074_v53  ;;  %v1130_v60 = vadd.f32 %v1772_v1, %v1129_v9  ;;  %v1084_v8 = vmul.f32 1.442695, %v2803_v35  ;;  %v1167_v58 = vadd.f32 %v1774_v14, %v1166_v55  ;;  %v2819_v55 = vld [vmem:[#allocation25_spill] sm:$0xff] }
 0x214   : > { %v1788_v57 = vpop.eup %1787  ;;  %1807 = vpow2.f32 %v1076_v45  ;;  %v2805_v59 = vsub.f32 %v2804_v62, %v2221_v42  ;;  %v2807_v6 = vsub.f32 %v2806_v2, %v2217_v38  ;;  %v2809_v16 = vsub.f32 %v2808_v10, %v2221_v42  ;;  %1313 = vmatprep.subr.bf16.mxu1 %v1262_v52  ;;  %v2816_v45 = vld [vmem:[#allocation23_spill] sm:$0xff]  ;;  %v2823_v62 = vld [vmem:[#allocation28_spill] sm:$0xff] }
 0x215   : > { %v1790_v4 = vpop.eup %1789  ;;  %1809 = vpow2.f32 %v1078_v51  ;;  %v1131_v44 = vadd.f32 %v2499_v25, %v1130_v60  ;;  %v1263_v50 = vpack.c.bf16 %v1788_v57, %v2515_v31  ;;  %v1168_v13 = vadd.f32 %v1778_v27, %v1167_v58  ;;  %v2812_v25 = vld [vmem:[#allocation21_spill] sm:$0xff]  ;;  %1314 = vmatpush1.bf16.msra.mxu1 %v1261_v30 }
 0x216   : > { %v1086_v49 = vmul.f32 1.442695, %v2805_v59  ;;  %v2531_v37 = vpop.eup %1791  ;;  %1811 = vpow2.f32 %v1080_v12  ;;  %v1088_v11 = vmul.f32 1.442695, %v2807_v6  ;;  %v1264_v63 = vpack.c.bf16 %v1790_v4, %v1786_v0 }
 0x217   : > { %v1794_v15 = vpop.eup %1793  ;;  %1813 = vpow2.f32 %v1082_v20  ;;  %v1090_v1 = vmul.f32 1.442695, %v2809_v16  ;;  %v1132_v23 = vadd.f32 %v1780_v7, %v1131_v44  ;;  %v2811_v14 = vsub.f32 %v2810_v34, %v2217_v38 }
 0x218   : > { %v1796_v17 = vpop.eup %1795  ;;  %1815 = vpow2.f32 %v1084_v8  ;;  %v1169_v3 = vadd.f32 %v1782_v22, %v1168_v13  ;;  %v2813_v39 = vsub.f32 %v2812_v25, %v2221_v42  ;;  %v2815_v21 = vsub.f32 %v2814_v36, %v2217_v38  ;;  %1315 = vmatprep.subr.bf16.mxu1 %v1264_v63 }
 0x219   : > { %v1092_v41 = vmul.f32 1.442695, %v2811_v14  ;;  %v1798_v19 = vpop.eup %1797  ;;  %1817 = vpow2.f32 %v1086_v49  ;;  %v1133_v32 = vadd.f32 %v2515_v31, %v1132_v23  ;;  %v1265_v43 = vpack.c.bf16 %v1796_v17, %v2531_v37  ;;  %1316 = vmatpush1.bf16.msra.mxu1 %v1263_v50 }
 0x21a   : > { %v1094_v46 = vmul.f32 1.442695, %v2813_v39  ;;  %v2547_v27 = vpop.eup %1799  ;;  %1819 = vpow2.f32 %v1088_v11  ;;  %v1096_v53 = vmul.f32 1.442695, %v2815_v21  ;;  %v1170_v61 = vadd.f32 %v1786_v0, %v1169_v3 }
 0x21b   : > { %v1266_v7 = vpack.c.bf16 %v1798_v19, %v1794_v15  ;;  %v1802_v40 = vpop.eup %1801  ;;  %1821 = vpow2.f32 %v1090_v1  ;;  %v2817_v5 = vsub.f32 %v2816_v45, %v2221_v42  ;;  %v1134_v29 = vadd.f32 %v1788_v57, %v1133_v32 }
 0x21c   : > { %v1804_v51 = vpop.eup %1803  ;;  %1823 = vpow2.f32 %v1092_v41  ;;  %v2818_v9 = vsub.f32 %v2746_v26, %v2217_v38  ;;  %v1171_v47 = vadd.f32 %v1790_v4, %v1170_v61  ;;  %v2820_v52 = vsub.f32 %v2819_v55, %v2221_v42 }
 0x21d   : > { %v1098_v22 = vmul.f32 1.442695, %v2817_v5  ;;  %v1806_v12 = vpop.eup %1805  ;;  %1825 = vpow2.f32 %v1094_v46  ;;  %v1135_v33 = vadd.f32 %v2531_v37, %v1134_v29  ;;  %v1267_v54 = vpack.c.bf16 %v1804_v51, %v2547_v27  ;;  %1317 = vmatprep.subr.bf16.mxu1 %v1266_v7  ;;  %v2825_v37 = vld [vmem:[#allocation29_spill] sm:$0xff] }
 0x21e   : > { %v1100_v31 = vmul.f32 1.442695, %v2818_v9  ;;  %v1102_v0 = vmul.f32 1.442695, %v2820_v52  ;;  %v1808_v20 = vpop.eup %1807  ;;  %1827 = vpow2.f32 %v1096_v53  ;;  %v2821_v30 = vsub.f32 %v2748_v28, %v2217_v38  ;;  %1318 = vmatpush1.bf16.msra.mxu1 %v1265_v43 }
 0x21f   : > { %v1172_v26 = vadd.f32 %v1794_v15, %v1171_v47  ;;  %v1268_v57 = vpack.c.bf16 %v1806_v12, %v1802_v40  ;;  %v1810_v56 = vpop.eup %1809  ;;  %1829 = vpow2.f32 %v1098_v22  ;;  %v2822_v35 = vsub.f32 %v2749_v18, %v2221_v42 }
 0x220   : > { %v1104_v60 = vmul.f32 1.442695, %v2821_v30  ;;  %v1136_v58 = vadd.f32 %v1796_v17, %v1135_v33  ;;  %v1812_v4 = vpop.eup %1811  ;;  %1831 = vpow2.f32 %v1100_v31  ;;  %v2824_v59 = vsub.f32 %v2823_v62, %v2217_v38 }
 0x221   : > { %v1106_v8 = vmul.f32 1.442695, %v2822_v35  ;;  %v1173_v44 = vadd.f32 %v1798_v19, %v1172_v26  ;;  %v1814_v28 = vpop.eup %1813  ;;  %1833 = vpow2.f32 %v1102_v0  ;;  %v2826_v2 = vsub.f32 %v2825_v37, %v2221_v42  ;;  %1319 = vmatprep.subr.bf16.mxu1 %v1268_v57 }
 0x222   : > { %v1108_v49 = vmul.f32 1.442695, %v2824_v59  ;;  %v1137_v11 = vadd.f32 %v2547_v27, %v1136_v58  ;;  %v1269_v18 = vpack.c.bf16 %v1812_v4, %v1808_v20  ;;  %v1816_v13 = vpop.eup %1815  ;;  %1835 = vpow2.f32 %v1104_v60  ;;  %1320 = vmatpush1.bf16.msra.mxu1 %v1267_v54  ;;  %v2829_v58 = vld [vmem:[#allocation32_spill] sm:$0xff] }
 0x223   : > { %v1110_v6 = vmul.f32 1.442695, %v2826_v2  ;;  %v2827_v50 = vsub.f32 %v2752_v48, %v2217_v38  ;;  %v1174_v15 = vadd.f32 %v1802_v40, %v1173_v44  ;;  %v1270_v10 = vpack.c.bf16 %v1814_v28, %v1810_v56  ;;  %v1818_v16 = vpop.eup %1817  ;;  %v1716_v2 = vld [vmem:[%s2202_s8 + $0x14] ss:$8 sps:$4 sm:$0xff]  }
 0x224   : > { %1837 = vpow2.f32 %v1106_v8  ;;  %v2828_v1 = vsub.f32 %v2189_v24, %v2221_v42  ;;  %v1138_v17 = vadd.f32 %v1804_v51, %v1137_v11  ;;  %v1820_v34 = vpop.eup %1819 }
 0x225   : > { %v1112_v63 = vmul.f32 1.442695, %v2827_v50  ;;  %1839 = vpow2.f32 %v1108_v49  ;;  %v1175_v14 = vadd.f32 %v1806_v12, %v1174_v15  ;;  %v1822_v41 = vpop.eup %1821  ;;  %v1271_v19 = vpack.c.bf16 %v1820_v34, %v1816_v13  ;;  %1321 = vmatprep.subr.bf16.mxu1 %v1270_v10  ;;  %v1718_v10 = vld [vmem:[%s2202_s8 + $0x10] ss:$8 sps:$4 sm:$0xff]  }
 0x226   : > { %v1114_v23 = vmul.f32 1.442695, %v2828_v1  ;;  %1841 = vpow2.f32 %v1110_v6  ;;  %v1139_v3 = vadd.f32 %v1808_v20, %v1138_v17  ;;  %v1824_v38 = vpop.eup %1823  ;;  %v1272_v25 = vpack.c.bf16 %v1822_v41, %v1818_v16  ;;  %1322 = vmatpush1.bf16.msra.mxu1 %v1269_v18 }
 0x227   : > { %1843 = vpow2.f32 %v1112_v63  ;;  %v1176_v48 = vadd.f32 %v1810_v56, %v1175_v14  ;;  %v1826_v39 = vpop.eup %1825  ;;  %v2832_v14 = vld [vmem:[#allocation31_spill] sm:$0xff] }
 0x228   : > { %1845 = vpow2.f32 %v1114_v23  ;;  %v1140_v46 = vadd.f32 %v1812_v4, %v1139_v3  ;;  %v1828_v24 = vpop.eup %1827  ;;  %1323 = vmatprep.subr.bf16.mxu1 %v1272_v25  ;;  %v2830_v4 = vld [vmem:[#allocation35_spill] sm:$0xff] }
 0x229   : > { %v1177_v42 = vadd.f32 %v1814_v28, %v1176_v48  ;;  %v1830_v32 = vpop.eup %1829  ;;  %v1273_v27 = vpack.c.bf16 %v1828_v24, %v1824_v38  ;;  %v2831_v62 = vsub.f32 %v2829_v58, %v2830_v4  ;;  %v1713_v28 = vld [vmem:[%s2202_s8] ss:$8 sps:$4 sm:$0xff]  }
 0x22a   : > { %v1141_v43 = vadd.f32 %v1816_v13, %v1140_v46  ;;  %v1832_v36 = vpop.eup %1831  ;;  %v1274_v53 = vpack.c.bf16 %v1830_v32, %v1826_v39  ;;  %1324 = vmatpush1.bf16.msra.mxu1 %v1271_v19 }
 0x22b   : > { %v1178_v21 = vadd.f32 %v1818_v16, %v1177_v42  ;;  %v1834_v61 = vpop.eup %1833  ;;  %v911_v59 = vmul.f32 1.442695, %v2831_v62 }
 0x22c   : > { %v1142_v7 = vadd.f32 %v1820_v34, %v1141_v43  ;;  %v1836_v40 = vpop.eup %1835  ;;  %1325 = vmatprep.subr.bf16.mxu1 %v1274_v53  ;;  %v1116_v34 = vld [vmem:[#allocation3] sm:$0x3] }
 0x22d   : > { %v1179_v45 = vadd.f32 %v1822_v41, %v1178_v21  ;;  %v1275_v29 = vpack.c.bf16 %v1836_v40, %v1832_v36  ;;  %1847 = vpow2.f32 %v911_v59 }
 0x22e   : > { %v1838_v5 = vpop.eup %1837  ;;  %v1143_v22 = vadd.f32 %v1824_v38, %v1142_v7  ;;  %1326 = vmatpush1.bf16.msra.mxu1 %v1273_v27  ;;  %v1402_v7 = vstv %s1374_s9 }
 0x22f   : > { %v1840_v51 = vpop.eup %1839  ;;  %v1180_v9 = vadd.f32 %v1826_v39, %v1179_v45  ;;  %v1276_v31 = vpack.c.bf16 %v1838_v5, %v1834_v61  ;;  %v2834_v39 = vld [vmem:[#allocation33_spill] sm:$0xff] }
 0x230   : > { %v1842_v47 = vpop.eup %1841  ;;  %v1144_v12 = vadd.f32 %v1828_v24, %v1143_v22  ;;  %v2835_v24 = vld [vmem:[#allocation34_spill] sm:$0xff] }
 0x231   : > { %v1844_v55 = vpop.eup %1843  ;;  %v1181_v52 = vadd.f32 %v1830_v32, %v1180_v9  ;;  %1327 = vmatprep.subr.bf16.mxu1 %v1276_v31  ;;  %v1411_v9 = vld [vmem:[%s2598_s13] sm:$0xff] }
 0x232   : > { %v1846_v0 = vpop.eup %1845  ;;  %v1145_v33 = vadd.f32 %v1832_v36, %v1144_v12  ;;  %v1277_v54 = vpack.c.bf16 %v1844_v55, %v1840_v51  ;;  %1328 = vmatpush1.bf16.msra.mxu1 %v1275_v29 }
 0x233   : > { %v1182_v20 = vadd.f32 %v1834_v61, %v1181_v52  ;;  %v1278_v30 = vpack.c.bf16 %v1846_v0, %v1842_v47 }
 0x234   : > { %v1146_v60 = vadd.f32 %v1836_v40, %v1145_v33  ;;  %v1413_v33 = vld [vmem:[%s2598_s13 + $0x10] sm:$0xff] }
 0x235   : > { %v1183_v26 = vadd.f32 %v1838_v5, %v1182_v20  ;;  %1329 = vmatprep.subr.bf16.mxu1 %v1278_v30 }
 0x236   : > { %v1147_v57 = vadd.f32 %v1840_v51, %v1146_v60  ;;  %1330 = vmatpush1.bf16.msra.mxu1 %v1277_v54  ;;  %v1414_v60 = vld [vmem:[%s2598_s13 + $0x18] sm:$0xff] }
 0x237   : > { %v1184_v56 = vadd.f32 %v1842_v47, %v1183_v26  ;;  %v1848_v17 = vpop.eup %1847 }
 0x238   : > { %v1148_v35 = vadd.f32 %v1844_v55, %v1147_v57  ;;  %v1117_v3 = vmul.f32 %v1848_v17, %v1116_v34  ;;  %v1228_v46 = vrot.slane %v1848_v17, %v2834_v39  ;;  %v1232_v42 = vrot.slane %v1848_v17, %v2835_v24  ;;  %v1412_v55 = vld [vmem:[%s2598_s13 + $0x8] sm:$0xff] }
 0x239   : > { %v1185_v8 = vadd.f32 %v1846_v0, %v1184_v56  ;;  %1332 = vmatmul.mubr.bf16.vlgmr.msra.gmra.mrb[0].mxu1 %v1713_v28 }
 0x23a   : > { %v1149_v49 = vrot.slane %v1148_v35, 4  ;;  %1341 = vmatprep.mubr.bf16.mxu1 %v1716_v2  ;;  %v1235_v43 = vmul.f32 0.0, %v1228_v46  ;;  %v1236_v36 = vmul.f32 0.0, %v1232_v42 }
 0x23b   : > { %v1186_v44 = vrot.slane %v1185_v8, 4 }
 0x23c   : > { %v1150_v37 = vadd.f32 %v1149_v49, %v1148_v35 }
 0x23d   : > { %v1187_v6 = vadd.f32 %v1186_v44, %v1185_v8 }
 0x23e   : > { %v1151_v11 = vrot.slane %v1150_v37, 2 }
 0x23f   : > { %v1188_v18 = vrot.slane %v1187_v6, 2 }
 0x240   : > { %v1152_v13 = vadd.f32 %v1151_v11, %v1150_v37  ;;  %v1415_v37 = vld [vmem:[%s2598_s13 + $0x20] sm:$0xff] }
 0x241   : > { %v1189_v50 = vadd.f32 %v1188_v18, %v1187_v6  ;;  %1342 = vmatmul.mubr.bf16.gmra.mrb[4].mxu1 %v1718_v10  ;;  %v1416_v18 = vld [vmem:[%s2598_s13 + $0x28] sm:$0xff] }
 0x242   : > { %v1153_v63 = vrot.slane %v1152_v13, 1 }
 0x243   : > { %v1190_v15 = vrot.slane %v1189_v50, 1 }
 0x244   : > { %v1154_v16 = vadd.f32 %v1153_v63, %v1152_v13  ;;  %v1417_v63 = vld [vmem:[%s2598_s13 + $0x30] sm:$0xff] }
 0x245   : > { %v1191_v1 = vadd.f32 %v1190_v15, %v1189_v50 }
 0x247   : > { %v1194_v23 = vcombine.low %v1154_v16, %v1191_v1  ;;  %v1418_v1 = vld [vmem:[%s2598_s13 + $0x38] sm:$0xff] }
 0x249   : > { %v1201_v41 = vrot.slane %v1194_v23, %v2832_v14 }
 0x24b   : > { %v1208_v19 = vrot.slane %v1201_v41, %v2832_v14 }
 0x24d   : > { %v1210_v38 = vadd.f32 %v1208_v19, %v1117_v3 }
 0x24f   : > { %1215 = vst.msk [vmem:[#allocation3] sm:$0x3] %vm2006_vm0, %v1210_v38 }
 0x256   : > { %v1372_v25 = vld [vmem:[#allocation3] sm:$0x3] }
 0x257   : > { %1849 = vrcp.f32 %v1372_v25 }
 0x261   : > { %v1850_v32 = vpop.eup %1849 }
 0x262   : > { %v1387_v53 = vrot.slane %v1850_v32, %v2834_v39  ;;  %v1391_v45 = vrot.slane %v1850_v32, %v2835_v24 }
 0x30c   : > { %v1333_v27 = vpop.f32.mrb[0].mxu1 }
 0x30d   : > { %v1352_v21 = vadd.f32 %v1333_v27, %v1235_v43  ;;  %v1335_v61 = vpop.f32.mrb[1].mxu1 }
 0x30e   : > { %v1353_v40 = vadd.f32 %v1335_v61, %v1236_v36  ;;  %v1337_v5 = vpop.f32.mrb[2].mxu1 }
 0x30f   : > { %v1394_v22 = vmul.f32 %v1387_v53, %v1352_v21  ;;  %v1354_v29 = vadd.f32 %v1337_v5, %v1235_v43  ;;  %v1339_v51 = vpop.f32.mrb[3].mxu1 }
 0x310   : > { %v1395_v31 = vmul.f32 %v1391_v45, %v1353_v40  ;;  %v1355_v47 = vadd.f32 %v1339_v51, %v1236_v36 }
 0x311   : > { %v1403_v12 = vmul.f32 %v1402_v7, %v1394_v22  ;;  %v1396_v52 = vmul.f32 %v1387_v53, %v1354_v29 }
 0x312   : > { %v1404_v0 = vmul.f32 %v1402_v7, %v1395_v31  ;;  %v1397_v54 = vmul.f32 %v1391_v45, %v1355_v47 }
 0x313   : > { %v1419_v20 = vadd.f32 %v1411_v9, %v1403_v12  ;;  %v1405_v30 = vmul.f32 %v1402_v7, %v1396_v52 }
 0x314   : > { %v1420_v26 = vadd.f32 %v1412_v55, %v1404_v0  ;;  %v1406_v57 = vmul.f32 %v1402_v7, %v1397_v54  ;;  %v1343_v56 = vpop.f32.mrb[4].mxu1 }
 0x315   : > { %1427 = vst [vmem:[%s2607_s16] sm:$0xff] %v1419_v20  ;;  %v1421_v35 = vadd.f32 %v1413_v33, %v1405_v30  ;;  %v1356_v8 = vadd.f32 %v1343_v56, %v1235_v43  ;;  %v1345_v58 = vpop.f32.mrb[5].mxu1 }
 0x316   : > { %1428 = vst [vmem:[%s2607_s16 + $0x8] sm:$0xff] %v1420_v26  ;;  %v1422_v4 = vadd.f32 %v1414_v60, %v1406_v57  ;;  %v1357_v62 = vadd.f32 %v1345_v58, %v1236_v36  ;;  %v1347_v59 = vpop.f32.mrb[6].mxu1 }
 0x317   : > { %1429 = vst [vmem:[%s2607_s16 + $0x10] sm:$0xff] %v1421_v35  ;;  %v1398_v49 = vmul.f32 %v1387_v53, %v1356_v8  ;;  %v1358_v44 = vadd.f32 %v1347_v59, %v1235_v43  ;;  %v1349_v28 = vpop.f32.mrb[7].mxu1 }
 0x318   : > { %1430 = vst [vmem:[%s2607_s16 + $0x18] sm:$0xff] %v1422_v4  ;;  %v1399_v2 = vmul.f32 %v1391_v45, %v1357_v62  ;;  %v1359_v6 = vadd.f32 %v1349_v28, %v1236_v36 }
 0x319   : > { %v1407_v11 = vmul.f32 %v1402_v7, %v1398_v49  ;;  %v1400_v13 = vmul.f32 %v1387_v53, %v1358_v44 }
 0x31a   : > { %v1408_v50 = vmul.f32 %v1402_v7, %v1399_v2  ;;  %v1401_v15 = vmul.f32 %v1391_v45, %v1359_v6 }
 0x31b   : > { %v1423_v10 = vadd.f32 %v1415_v37, %v1407_v11  ;;  %v1409_v16 = vmul.f32 %v1402_v7, %v1400_v13 }
 0x31c   : > { %v1424_v23 = vadd.f32 %v1416_v18, %v1408_v50  ;;  %v1410_v17 = vmul.f32 %v1402_v7, %v1401_v15 }
 0x31d   : > { %1431 = vst [vmem:[%s2607_s16 + $0x20] sm:$0xff] %v1423_v10  ;;  %v1425_v34 = vadd.f32 %v1417_v63, %v1409_v16 }
 0x31e   : > { %1432 = vst [vmem:[%s2607_s16 + $0x28] sm:$0xff] %v1424_v23  ;;  %v1426_v14 = vadd.f32 %v1418_v1, %v1410_v17 }
 0x31f   : > { %1433 = vst [vmem:[%s2607_s16 + $0x30] sm:$0xff] %v1425_v34 }
 0x320   : > { %1434 = vst [vmem:[%s2607_s16 + $0x38] sm:$0xff] %v1426_v14 }
 0x321 PF: > { %s16_s22 = sadd.s32 1, %s1873_s22   ;;  %s2836_s20 = smov %s1869_s21 }
 0x322   : > { %p13_p5 = scmp.ge.s32.totalorder %s16_s22, 4   ;;  %s2837_s21 = smov %s2839_s4 }
 0x324   :  { %15 = sbr.rel (!%p13_p5) target bundleno = 2 (0x2), region = 87 }

</bundles_post_ra>
